<compile_context>
chip_gen: v7x
topology: tpu7x:2x2x1
jax: 0.10.0
libtpu: 0.0.40
codegen_flags: <defaults>
</compile_context>

<pallas_src>
import jax
import jax.numpy as jnp
from jax.experimental import pallas as pl
from jax.experimental.pallas import tpu as pltpu


_TAPS = tuple((dy, dx) for dy in (-1, 0, 1) for dx in (-1, 0, 1))


# ------------------------------ fused kernel --------------------------------

def _make_grdb_kernel(C, L, R, H, W, Cp, pad):
    """Fused GRDB kernel; one grid step == one batch image."""
    Npix = H * W

    def kernel(x_ref, masks_ref, convw_ref, finw_ref, out_ref):
        x = x_ref[...]                     # (Cp, Npix); row C is the ones (bias) channel
        masks = masks_ref[...]             # (2, Npix)
        m_neg = masks[0:1, :]              # 0.0 where col x == 0     (dx = -1 taps)
        m_pos = masks[1:2, :]              # 0.0 where col x == W-1   (dx = +1 taps)
        zpad = jnp.zeros((Cp, pad), jnp.float32)   # hoisted, reused by every block

        def make_tapblock(block):
            """(Cp, Npix) channel block -> (9*Cp, Npix) stack of its 9 shifted taps."""
            fpad = jnp.concatenate([zpad, block, zpad], axis=1)   # (Cp, Npix+2*pad)
            pieces = []
            for (dy, dx) in _TAPS:                 # tap order == (ky, kx) weight order
                start = pad + dy * W + dx
                sh = fpad[:, start:start + Npix]   # dy out-of-range rows hit zero pad
                if dx == -1:
                    sh = sh * m_neg                # undo row wraparound of flat axis
                elif dx == 1:
                    sh = sh * m_pos
                pieces.append(sh)
            return jnp.concatenate(pieces, axis=0)  # (9*Cp, Npix), 8-row aligned pieces

        # x's 9 shifted taps: computed ONCE, reused by every layer of every RDB.
        x_taps = make_tapblock(x)

        # Folded final: (I + sum_r wgT_r + sum_r wgT_r@wfT_r[:, :C]) @ x  + bconst
        # (bconst rides on the ones row of x via column C of finw[0]).
        fin_acc = jnp.dot(finw_ref[0], x, preferred_element_type=jnp.float32)

        widx = 0
        for r in range(R):
            rdb_taps = []                          # tap blocks of this RDB's layer outputs
            for i in range(L):
                # 3x3 conv (+ folded bias) as per-channel-block matmuls.
                acc = jnp.dot(convw_ref[widx], x_taps,
                              preferred_element_type=jnp.float32)
                widx += 1
                for j in range(i):
                    acc = acc + jnp.dot(convw_ref[widx], rdb_taps[j],
                                        preferred_element_type=jnp.float32)
                    widx += 1
                out_i = jnp.maximum(acc, 0.0)      # (Cp, Npix); pad rows stay 0

                # Folded (final 1x1 -> global 1x1) contribution of this layer block.
                fin_acc = fin_acc + jnp.dot(finw_ref[1 + r * L + i], out_i,
                                            preferred_element_type=jnp.float32)

                if i < L - 1:                      # the last layer's taps are never used
                    rdb_taps.append(make_tapblock(out_i))

        out_ref[...] = fin_acc                     # residual + biases already folded in

    return kernel


# ------------------------------- wrapper -------------------------------------

def grdb_forward(x_nchw, params):
    """Fused GRDB forward.  x_nchw: (B, C, H, W) float32 (PyTorch NCHW)."""
    B, C, H, W = x_nchw.shape
    Npix = H * W
    rdbs = params["rdbs"]
    R = len(rdbs)
    L = len(rdbs[0]["layers"])
    g = rdbs[0]["layers"][0][0].shape[-1]
    Cp = ((max(C + 1, g) + 7) // 8) * 8        # 8-aligned channel block (room for ones ch)
    pad = ((W + 1 + 127) // 128) * 128          # lane-aligned halo (>= W+1)

    # ---- input: pad channels to Cp, append the constant ones (bias) channel ----
    x2 = x_nchw.astype(jnp.float32).reshape(B, C, Npix)
    x_pad = jnp.concatenate(
        [x2,
         jnp.ones((B, 1, Npix), jnp.float32),
         jnp.zeros((B, Cp - C - 1, Npix), jnp.float32)], axis=1)   # (B, Cp, Npix)

    # ---- column-validity masks for the dx = -1 / +1 taps ----
    wcol = jnp.arange(Npix, dtype=jnp.int32) % W
    masks = jnp.stack([(wcol >= 1).astype(jnp.float32),
                       (wcol <= W - 2).astype(jnp.float32)], axis=0)   # (2, Npix)

    # ---- conv-weight slab: one (Cp, 9*Cp) slice per (rdb, layer, in-block) ----
    conv_slices = []
    for rp in rdbs:
        for i, (w33, bias) in enumerate(rp["layers"]):
            w_t = jnp.transpose(w33, (3, 0, 1, 2)).astype(jnp.float32)  # (g, 3, 3, cin)
            for b in range(i + 1):
                if b == 0:
                    c0, c1 = 0, C                                        # x block
                else:
                    c0, c1 = C + (b - 1) * g, C + b * g                  # layer b-1 block
                bw = c1 - c0
                wb = jnp.pad(w_t[:, :, :, c0:c1],
                             ((0, Cp - g), (0, 0), (0, 0), (0, Cp - bw)))
                wb = wb.reshape(Cp, 9 * Cp)        # col = (ky*3+kx)*Cp + ch
                if b == 0:
                    # fold bias into the center-tap column of the ones channel
                    bcol = jnp.pad(bias.astype(jnp.float32), (0, Cp - g))
                    wb = wb.at[:, 4 * Cp + C].set(bcol)
                conv_slices.append(wb)
    convw = jnp.stack(conv_slices, axis=0)         # (NS, Cp, 9*Cp)

    # ---- folded-final slab: per-RDB final 1x1 folded into the global 1x1 ----
    wg, bg = params["final"]                       # wg: (R*C, C), bg: (C,)
    Wx = jnp.eye(C, dtype=jnp.float32)             # outer residual skip
    bconst = bg.astype(jnp.float32)
    per_rdb = []
    for r, rp in enumerate(rdbs):
        wf, bf = rp["final"]                       # wf: (cin_f, C), bf: (C,)
        wgT = jnp.transpose(wg[r * C:(r + 1) * C, :]).astype(jnp.float32)  # (C, C)
        wcomb = wgT @ jnp.transpose(wf).astype(jnp.float32)                # (C, cin_f)
        Wx = Wx + wgT + wcomb[:, :C]               # inner skip + x columns of wf
        bconst = bconst + wgT @ bf.astype(jnp.float32)
        per_rdb.append(wcomb)
    fin_blocks = []
    wfin_x = jnp.zeros((C, Cp), jnp.float32)
    wfin_x = wfin_x.at[:, :C].set(Wx)
    wfin_x = wfin_x.at[:, C].set(bconst)           # rides on the ones channel
    fin_blocks.append(wfin_x)
    for r in range(R):
        for i in range(L):
            blk = per_rdb[r][:, C + i * g: C + (i + 1) * g]                # (C, g)
            fin_blocks.append(jnp.pad(blk, ((0, 0), (0, Cp - g))))
    finw = jnp.stack(fin_blocks, axis=0)           # (NF, C, Cp)

    in_specs = [
        pl.BlockSpec((None, Cp, Npix), lambda b: (b, 0, 0)),   # x (per image)
        pl.BlockSpec(masks.shape, lambda b: (0, 0)),           # dx masks
        pl.BlockSpec(convw.shape, lambda b: (0, 0, 0)),        # conv-weight slab
        pl.BlockSpec(finw.shape, lambda b: (0, 0, 0)),         # folded-final slab
    ]

    kernel = _make_grdb_kernel(C, L, R, H, W, Cp, pad)
    out = pl.pallas_call(
        kernel,
        out_shape=jax.ShapeDtypeStruct((B, C, Npix), jnp.float32),
        grid_spec=pltpu.PrefetchScalarGridSpec(
            num_scalar_prefetch=0,
            grid=(B,),
            in_specs=in_specs,
            out_specs=pl.BlockSpec((None, C, Npix), lambda b: (b, 0, 0)),
        ),
        compiler_params=pltpu.CompilerParams(
            dimension_semantics=("parallel",)),
    )(x_pad, masks, convw, finw)
    return out.reshape(B, C, H, W)


# --------------------------- deterministic params ----------------------------

def init_params(key, in_channels, growth_rate, num_layers, num_rdb_blocks):
    keys = jax.random.split(key, num_rdb_blocks + 1)
    rdbs = []
    for r in range(num_rdb_blocks):
        lk = jax.random.split(keys[r], num_layers + 1)
        layers = []
        for i in range(num_layers):
            cin = in_channels + i * growth_rate
            wk, bk = jax.random.split(lk[i])
            w = 0.1 * jax.random.normal(wk, (3, 3, cin, growth_rate), jnp.float32)
            b = 0.1 * jax.random.normal(bk, (growth_rate,), jnp.float32)
            layers.append((w, b))
        cin_f = in_channels + num_layers * growth_rate
        wk, bk = jax.random.split(lk[num_layers])
        wf = 0.1 * jax.random.normal(wk, (cin_f, in_channels), jnp.float32)
        bf = 0.1 * jax.random.normal(bk, (in_channels,), jnp.float32)
        rdbs.append({"layers": layers, "final": (wf, bf)})
    wk, bk = jax.random.split(keys[-1])
    cin_g = in_channels * num_rdb_blocks
    wg = 0.1 * jax.random.normal(wk, (cin_g, in_channels), jnp.float32)
    bg = 0.1 * jax.random.normal(bk, (in_channels,), jnp.float32)
    return {"rdbs": rdbs, "final": (wg, bg)}


# ----------------------------- pure-JAX reference ----------------------------

def _conv3x3_ref(x, w33, b):
    return jax.lax.conv_general_dilated(
        x, w33, window_strides=(1, 1), padding="SAME",
        dimension_numbers=("NHWC", "HWIO", "NHWC")) + b


def grdb_reference(x_nchw, params):
    x = jnp.transpose(x_nchw, (0, 2, 3, 1)).astype(jnp.float32)
    outs = []
    for rp in params["rdbs"]:
        feats = x
        for (w33, b) in rp["layers"]:
            feats = jnp.concatenate(
                [feats, jax.nn.relu(_conv3x3_ref(feats, w33, b))], axis=-1)
        wf, bf = rp["final"]
        outs.append(x + jnp.einsum("bhwc,co->bhwo", feats, wf) + bf)
    concat = jnp.concatenate(outs, axis=-1)
    wg, bg = params["final"]
    out = x + jnp.einsum("bhwc,co->bhwo", concat, wg) + bg
    return jnp.transpose(out, (0, 3, 1, 2))


# ----------------------------------- main ------------------------------------

if __name__ == "__main__":
    in_channels, growth_rate, num_layers, num_rdb_blocks = 4, 4, 3, 2
    B, H, W = 2, 16, 16

    key = jax.random.PRNGKey(0)
    kx, kp = jax.random.split(key)
    x = jax.random.normal(kx, (B, in_channels, H, W), jnp.float32)  # NCHW input
    params = init_params(kp, in_channels, growth_rate, num_layers, num_rdb_blocks)

    out = jax.block_until_ready(grdb_forward(x, params))
    ref = jax.block_until_ready(grdb_reference(x, params))

    assert out.shape == (B, in_channels, H, W), out.shape
    max_err = float(jnp.max(jnp.abs(out - ref)))
    assert jnp.allclose(out, ref, rtol=1e-3, atol=2e-3), max_err

    print("KERNEL_OK")
</pallas_src>

<mosaic_0001>
module attributes {stable_mosaic.version = 11 : i64} {
  func.func @kernel(%arg0: i32, %arg1: memref<1x8x256xf32, #tpu.memory_space<vmem>>, %arg2: memref<2x256xf32, #tpu.memory_space<vmem>>, %arg3: memref<12x8x72xf32, #tpu.memory_space<vmem>>, %arg4: memref<7x4x8xf32, #tpu.memory_space<vmem>>, %arg5: memref<1x4x256xf32, #tpu.memory_space<vmem>>) attributes {dimension_semantics = [#tpu.dimension_semantics<parallel>], iteration_bounds = array<i64: 2>, scalar_prefetch = 0 : i64, scratch_operands = 0 : i64, tpu.core_type = #tpu.core_type<tc>, window_params = [{transform_indices = @transform_0, window_bounds = array<i64: 1, 8, 256>}, {pipeline_mode = #tpu.pipeline_mode<synchronous>, transform_indices = @transform_1, window_bounds = array<i64: 2, 256>}, {pipeline_mode = #tpu.pipeline_mode<synchronous>, transform_indices = @transform_2, window_bounds = array<i64: 12, 8, 72>}, {pipeline_mode = #tpu.pipeline_mode<synchronous>, transform_indices = @transform_3, window_bounds = array<i64: 7, 4, 8>}, {transform_indices = @transform_4, window_bounds = array<i64: 1, 4, 256>}]} {
    %c0 = arith.constant 0 : index
    %c0_0 = arith.constant 0 : index
    %c0_1 = arith.constant 0 : index
    %0 = vector.load %arg1[%c0, %c0_0, %c0_1] : memref<1x8x256xf32, #tpu.memory_space<vmem>>, vector<1x8x256xf32>
    %1 = vector.shape_cast %0 : vector<1x8x256xf32> to vector<8x256xf32>
    %c0_2 = arith.constant 0 : index
    %c0_3 = arith.constant 0 : index
    %2 = vector.load %arg2[%c0_2, %c0_3] : memref<2x256xf32, #tpu.memory_space<vmem>>, vector<2x256xf32>
    %3 = vector.extract_strided_slice %2 {offsets = [0, 0], sizes = [1, 256], strides = [1, 1]} : vector<2x256xf32> to vector<1x256xf32>
    %4 = vector.extract_strided_slice %2 {offsets = [1, 0], sizes = [1, 256], strides = [1, 1]} : vector<2x256xf32> to vector<1x256xf32>
    %cst = arith.constant 0.000000e+00 : f32
    %5 = vector.broadcast %cst : f32 to vector<8x128xf32>
    %6 = tpu.concatenate %5, %1, %5 in 1 : vector<8x128xf32>, vector<8x256xf32>, vector<8x128xf32> -> vector<8x512xf32>
    %7 = vector.extract_strided_slice %6 {offsets = [0, 111], sizes = [8, 256], strides = [1, 1]} : vector<8x512xf32> to vector<8x256xf32>
    %8 = vector.broadcast %3 : vector<1x256xf32> to vector<8x256xf32>
    %9 = arith.mulf %7, %8 : vector<8x256xf32>
    %10 = vector.extract_strided_slice %6 {offsets = [0, 112], sizes = [8, 256], strides = [1, 1]} : vector<8x512xf32> to vector<8x256xf32>
    %11 = vector.extract_strided_slice %6 {offsets = [0, 113], sizes = [8, 256], strides = [1, 1]} : vector<8x512xf32> to vector<8x256xf32>
    %12 = vector.broadcast %4 : vector<1x256xf32> to vector<8x256xf32>
    %13 = arith.mulf %11, %12 : vector<8x256xf32>
    %14 = vector.extract_strided_slice %6 {offsets = [0, 127], sizes = [8, 256], strides = [1, 1]} : vector<8x512xf32> to vector<8x256xf32>
    %15 = vector.broadcast %3 : vector<1x256xf32> to vector<8x256xf32>
    %16 = arith.mulf %14, %15 : vector<8x256xf32>
    %17 = vector.extract_strided_slice %6 {offsets = [0, 128], sizes = [8, 256], strides = [1, 1]} : vector<8x512xf32> to vector<8x256xf32>
    %18 = vector.extract_strided_slice %6 {offsets = [0, 129], sizes = [8, 256], strides = [1, 1]} : vector<8x512xf32> to vector<8x256xf32>
    %19 = vector.broadcast %4 : vector<1x256xf32> to vector<8x256xf32>
    %20 = arith.mulf %18, %19 : vector<8x256xf32>
    %21 = vector.extract_strided_slice %6 {offsets = [0, 143], sizes = [8, 256], strides = [1, 1]} : vector<8x512xf32> to vector<8x256xf32>
    %22 = vector.broadcast %3 : vector<1x256xf32> to vector<8x256xf32>
    %23 = arith.mulf %21, %22 : vector<8x256xf32>
    %24 = vector.extract_strided_slice %6 {offsets = [0, 144], sizes = [8, 256], strides = [1, 1]} : vector<8x512xf32> to vector<8x256xf32>
    %25 = vector.extract_strided_slice %6 {offsets = [0, 145], sizes = [8, 256], strides = [1, 1]} : vector<8x512xf32> to vector<8x256xf32>
    %26 = vector.broadcast %4 : vector<1x256xf32> to vector<8x256xf32>
    %27 = arith.mulf %25, %26 : vector<8x256xf32>
    %28 = tpu.concatenate %9, %10, %13, %16, %17, %20, %23, %24, %27 in 0 : vector<8x256xf32>, vector<8x256xf32>, vector<8x256xf32>, vector<8x256xf32>, vector<8x256xf32>, vector<8x256xf32>, vector<8x256xf32>, vector<8x256xf32>, vector<8x256xf32> -> vector<72x256xf32>
    %c0_4 = arith.constant 0 : index
    %c0_5 = arith.constant 0 : index
    %c0_6 = arith.constant 0 : index
    %29 = vector.load %arg4[%c0_4, %c0_5, %c0_6] : memref<7x4x8xf32, #tpu.memory_space<vmem>>, vector<1x4x8xf32>
    %30 = vector.shape_cast %29 : vector<1x4x8xf32> to vector<4x8xf32>
    %cst_7 = arith.constant dense<0.000000e+00> : vector<4x256xf32>
    %31 = tpu.matmul %30, %1, %cst_7 {dimension_numbers = #tpu.dot_dimension_numbers<[1], [0], [0], [1], [0, 0, 1, 1], [], []>} : vector<4x8xf32>, vector<8x256xf32>, vector<4x256xf32> -> vector<4x256xf32>
    %c0_8 = arith.constant 0 : index
    %c0_9 = arith.constant 0 : index
    %c0_10 = arith.constant 0 : index
    %32 = vector.load %arg3[%c0_8, %c0_9, %c0_10] : memref<12x8x72xf32, #tpu.memory_space<vmem>>, vector<1x8x72xf32>
    %33 = vector.shape_cast %32 : vector<1x8x72xf32> to vector<8x72xf32>
    %cst_11 = arith.constant dense<0.000000e+00> : vector<8x256xf32>
    %34 = tpu.matmul %33, %28, %cst_11 {dimension_numbers = #tpu.dot_dimension_numbers<[1], [0], [0], [1], [0, 0, 1, 1], [], []>} : vector<8x72xf32>, vector<72x256xf32>, vector<8x256xf32> -> vector<8x256xf32>
    %cst_12 = arith.constant 0.000000e+00 : f32
    %35 = vector.broadcast %cst_12 : f32 to vector<8x256xf32>
    %36 = arith.maximumf %34, %35 : vector<8x256xf32>
    %c1 = arith.constant 1 : index
    %c0_13 = arith.constant 0 : index
    %c0_14 = arith.constant 0 : index
    %37 = vector.load %arg4[%c1, %c0_13, %c0_14] : memref<7x4x8xf32, #tpu.memory_space<vmem>>, vector<1x4x8xf32>
    %38 = vector.shape_cast %37 : vector<1x4x8xf32> to vector<4x8xf32>
    %cst_15 = arith.constant dense<0.000000e+00> : vector<4x256xf32>
    %39 = tpu.matmul %38, %36, %cst_15 {dimension_numbers = #tpu.dot_dimension_numbers<[1], [0], [0], [1], [0, 0, 1, 1], [], []>} : vector<4x8xf32>, vector<8x256xf32>, vector<4x256xf32> -> vector<4x256xf32>
    %40 = arith.addf %31, %39 : vector<4x256xf32>
    %41 = tpu.concatenate %5, %36, %5 in 1 : vector<8x128xf32>, vector<8x256xf32>, vector<8x128xf32> -> vector<8x512xf32>
    %42 = vector.extract_strided_slice %41 {offsets = [0, 111], sizes = [8, 256], strides = [1, 1]} : vector<8x512xf32> to vector<8x256xf32>
    %43 = vector.broadcast %3 : vector<1x256xf32> to vector<8x256xf32>
    %44 = arith.mulf %42, %43 : vector<8x256xf32>
    %45 = vector.extract_strided_slice %41 {offsets = [0, 112], sizes = [8, 256], strides = [1, 1]} : vector<8x512xf32> to vector<8x256xf32>
    %46 = vector.extract_strided_slice %41 {offsets = [0, 113], sizes = [8, 256], strides = [1, 1]} : vector<8x512xf32> to vector<8x256xf32>
    %47 = vector.broadcast %4 : vector<1x256xf32> to vector<8x256xf32>
    %48 = arith.mulf %46, %47 : vector<8x256xf32>
    %49 = vector.extract_strided_slice %41 {offsets = [0, 127], sizes = [8, 256], strides = [1, 1]} : vector<8x512xf32> to vector<8x256xf32>
    %50 = vector.broadcast %3 : vector<1x256xf32> to vector<8x256xf32>
    %51 = arith.mulf %49, %50 : vector<8x256xf32>
    %52 = vector.extract_strided_slice %41 {offsets = [0, 128], sizes = [8, 256], strides = [1, 1]} : vector<8x512xf32> to vector<8x256xf32>
    %53 = vector.extract_strided_slice %41 {offsets = [0, 129], sizes = [8, 256], strides = [1, 1]} : vector<8x512xf32> to vector<8x256xf32>
    %54 = vector.broadcast %4 : vector<1x256xf32> to vector<8x256xf32>
    %55 = arith.mulf %53, %54 : vector<8x256xf32>
    %56 = vector.extract_strided_slice %41 {offsets = [0, 143], sizes = [8, 256], strides = [1, 1]} : vector<8x512xf32> to vector<8x256xf32>
    %57 = vector.broadcast %3 : vector<1x256xf32> to vector<8x256xf32>
    %58 = arith.mulf %56, %57 : vector<8x256xf32>
    %59 = vector.extract_strided_slice %41 {offsets = [0, 144], sizes = [8, 256], strides = [1, 1]} : vector<8x512xf32> to vector<8x256xf32>
    %60 = vector.extract_strided_slice %41 {offsets = [0, 145], sizes = [8, 256], strides = [1, 1]} : vector<8x512xf32> to vector<8x256xf32>
    %61 = vector.broadcast %4 : vector<1x256xf32> to vector<8x256xf32>
    %62 = arith.mulf %60, %61 : vector<8x256xf32>
    %63 = tpu.concatenate %44, %45, %48, %51, %52, %55, %58, %59, %62 in 0 : vector<8x256xf32>, vector<8x256xf32>, vector<8x256xf32>, vector<8x256xf32>, vector<8x256xf32>, vector<8x256xf32>, vector<8x256xf32>, vector<8x256xf32>, vector<8x256xf32> -> vector<72x256xf32>
    %c1_16 = arith.constant 1 : index
    %c0_17 = arith.constant 0 : index
    %c0_18 = arith.constant 0 : index
    %64 = vector.load %arg3[%c1_16, %c0_17, %c0_18] : memref<12x8x72xf32, #tpu.memory_space<vmem>>, vector<1x8x72xf32>
    %65 = vector.shape_cast %64 : vector<1x8x72xf32> to vector<8x72xf32>
    %cst_19 = arith.constant dense<0.000000e+00> : vector<8x256xf32>
    %66 = tpu.matmul %65, %28, %cst_19 {dimension_numbers = #tpu.dot_dimension_numbers<[1], [0], [0], [1], [0, 0, 1, 1], [], []>} : vector<8x72xf32>, vector<72x256xf32>, vector<8x256xf32> -> vector<8x256xf32>
    %c2 = arith.constant 2 : index
    %c0_20 = arith.constant 0 : index
    %c0_21 = arith.constant 0 : index
    %67 = vector.load %arg3[%c2, %c0_20, %c0_21] : memref<12x8x72xf32, #tpu.memory_space<vmem>>, vector<1x8x72xf32>
    %68 = vector.shape_cast %67 : vector<1x8x72xf32> to vector<8x72xf32>
    %cst_22 = arith.constant dense<0.000000e+00> : vector<8x256xf32>
    %69 = tpu.matmul %68, %63, %cst_22 {dimension_numbers = #tpu.dot_dimension_numbers<[1], [0], [0], [1], [0, 0, 1, 1], [], []>} : vector<8x72xf32>, vector<72x256xf32>, vector<8x256xf32> -> vector<8x256xf32>
    %70 = arith.addf %66, %69 : vector<8x256xf32>
    %cst_23 = arith.constant 0.000000e+00 : f32
    %71 = vector.broadcast %cst_23 : f32 to vector<8x256xf32>
    %72 = arith.maximumf %70, %71 : vector<8x256xf32>
    %c2_24 = arith.constant 2 : index
    %c0_25 = arith.constant 0 : index
    %c0_26 = arith.constant 0 : index
    %73 = vector.load %arg4[%c2_24, %c0_25, %c0_26] : memref<7x4x8xf32, #tpu.memory_space<vmem>>, vector<1x4x8xf32>
    %74 = vector.shape_cast %73 : vector<1x4x8xf32> to vector<4x8xf32>
    %cst_27 = arith.constant dense<0.000000e+00> : vector<4x256xf32>
    %75 = tpu.matmul %74, %72, %cst_27 {dimension_numbers = #tpu.dot_dimension_numbers<[1], [0], [0], [1], [0, 0, 1, 1], [], []>} : vector<4x8xf32>, vector<8x256xf32>, vector<4x256xf32> -> vector<4x256xf32>
    %76 = arith.addf %40, %75 : vector<4x256xf32>
    %77 = tpu.concatenate %5, %72, %5 in 1 : vector<8x128xf32>, vector<8x256xf32>, vector<8x128xf32> -> vector<8x512xf32>
    %78 = vector.extract_strided_slice %77 {offsets = [0, 111], sizes = [8, 256], strides = [1, 1]} : vector<8x512xf32> to vector<8x256xf32>
    %79 = vector.broadcast %3 : vector<1x256xf32> to vector<8x256xf32>
    %80 = arith.mulf %78, %79 : vector<8x256xf32>
    %81 = vector.extract_strided_slice %77 {offsets = [0, 112], sizes = [8, 256], strides = [1, 1]} : vector<8x512xf32> to vector<8x256xf32>
    %82 = vector.extract_strided_slice %77 {offsets = [0, 113], sizes = [8, 256], strides = [1, 1]} : vector<8x512xf32> to vector<8x256xf32>
    %83 = vector.broadcast %4 : vector<1x256xf32> to vector<8x256xf32>
    %84 = arith.mulf %82, %83 : vector<8x256xf32>
    %85 = vector.extract_strided_slice %77 {offsets = [0, 127], sizes = [8, 256], strides = [1, 1]} : vector<8x512xf32> to vector<8x256xf32>
    %86 = vector.broadcast %3 : vector<1x256xf32> to vector<8x256xf32>
    %87 = arith.mulf %85, %86 : vector<8x256xf32>
    %88 = vector.extract_strided_slice %77 {offsets = [0, 128], sizes = [8, 256], strides = [1, 1]} : vector<8x512xf32> to vector<8x256xf32>
    %89 = vector.extract_strided_slice %77 {offsets = [0, 129], sizes = [8, 256], strides = [1, 1]} : vector<8x512xf32> to vector<8x256xf32>
    %90 = vector.broadcast %4 : vector<1x256xf32> to vector<8x256xf32>
    %91 = arith.mulf %89, %90 : vector<8x256xf32>
    %92 = vector.extract_strided_slice %77 {offsets = [0, 143], sizes = [8, 256], strides = [1, 1]} : vector<8x512xf32> to vector<8x256xf32>
    %93 = vector.broadcast %3 : vector<1x256xf32> to vector<8x256xf32>
    %94 = arith.mulf %92, %93 : vector<8x256xf32>
    %95 = vector.extract_strided_slice %77 {offsets = [0, 144], sizes = [8, 256], strides = [1, 1]} : vector<8x512xf32> to vector<8x256xf32>
    %96 = vector.extract_strided_slice %77 {offsets = [0, 145], sizes = [8, 256], strides = [1, 1]} : vector<8x512xf32> to vector<8x256xf32>
    %97 = vector.broadcast %4 : vector<1x256xf32> to vector<8x256xf32>
    %98 = arith.mulf %96, %97 : vector<8x256xf32>
    %99 = tpu.concatenate %80, %81, %84, %87, %88, %91, %94, %95, %98 in 0 : vector<8x256xf32>, vector<8x256xf32>, vector<8x256xf32>, vector<8x256xf32>, vector<8x256xf32>, vector<8x256xf32>, vector<8x256xf32>, vector<8x256xf32>, vector<8x256xf32> -> vector<72x256xf32>
    %c3 = arith.constant 3 : index
    %c0_28 = arith.constant 0 : index
    %c0_29 = arith.constant 0 : index
    %100 = vector.load %arg3[%c3, %c0_28, %c0_29] : memref<12x8x72xf32, #tpu.memory_space<vmem>>, vector<1x8x72xf32>
    %101 = vector.shape_cast %100 : vector<1x8x72xf32> to vector<8x72xf32>
    %cst_30 = arith.constant dense<0.000000e+00> : vector<8x256xf32>
    %102 = tpu.matmul %101, %28, %cst_30 {dimension_numbers = #tpu.dot_dimension_numbers<[1], [0], [0], [1], [0, 0, 1, 1], [], []>} : vector<8x72xf32>, vector<72x256xf32>, vector<8x256xf32> -> vector<8x256xf32>
    %c4 = arith.constant 4 : index
    %c0_31 = arith.constant 0 : index
    %c0_32 = arith.constant 0 : index
    %103 = vector.load %arg3[%c4, %c0_31, %c0_32] : memref<12x8x72xf32, #tpu.memory_space<vmem>>, vector<1x8x72xf32>
    %104 = vector.shape_cast %103 : vector<1x8x72xf32> to vector<8x72xf32>
    %cst_33 = arith.constant dense<0.000000e+00> : vector<8x256xf32>
    %105 = tpu.matmul %104, %63, %cst_33 {dimension_numbers = #tpu.dot_dimension_numbers<[1], [0], [0], [1], [0, 0, 1, 1], [], []>} : vector<8x72xf32>, vector<72x256xf32>, vector<8x256xf32> -> vector<8x256xf32>
    %106 = arith.addf %102, %105 : vector<8x256xf32>
    %c5 = arith.constant 5 : index
    %c0_34 = arith.constant 0 : index
    %c0_35 = arith.constant 0 : index
    %107 = vector.load %arg3[%c5, %c0_34, %c0_35] : memref<12x8x72xf32, #tpu.memory_space<vmem>>, vector<1x8x72xf32>
    %108 = vector.shape_cast %107 : vector<1x8x72xf32> to vector<8x72xf32>
    %cst_36 = arith.constant dense<0.000000e+00> : vector<8x256xf32>
    %109 = tpu.matmul %108, %99, %cst_36 {dimension_numbers = #tpu.dot_dimension_numbers<[1], [0], [0], [1], [0, 0, 1, 1], [], []>} : vector<8x72xf32>, vector<72x256xf32>, vector<8x256xf32> -> vector<8x256xf32>
    %110 = arith.addf %106, %109 : vector<8x256xf32>
    %cst_37 = arith.constant 0.000000e+00 : f32
    %111 = vector.broadcast %cst_37 : f32 to vector<8x256xf32>
    %112 = arith.maximumf %110, %111 : vector<8x256xf32>
    %c3_38 = arith.constant 3 : index
    %c0_39 = arith.constant 0 : index
    %c0_40 = arith.constant 0 : index
    %113 = vector.load %arg4[%c3_38, %c0_39, %c0_40] : memref<7x4x8xf32, #tpu.memory_space<vmem>>, vector<1x4x8xf32>
    %114 = vector.shape_cast %113 : vector<1x4x8xf32> to vector<4x8xf32>
    %cst_41 = arith.constant dense<0.000000e+00> : vector<4x256xf32>
    %115 = tpu.matmul %114, %112, %cst_41 {dimension_numbers = #tpu.dot_dimension_numbers<[1], [0], [0], [1], [0, 0, 1, 1], [], []>} : vector<4x8xf32>, vector<8x256xf32>, vector<4x256xf32> -> vector<4x256xf32>
    %116 = arith.addf %76, %115 : vector<4x256xf32>
    %c6 = arith.constant 6 : index
    %c0_42 = arith.constant 0 : index
    %c0_43 = arith.constant 0 : index
    %117 = vector.load %arg3[%c6, %c0_42, %c0_43] : memref<12x8x72xf32, #tpu.memory_space<vmem>>, vector<1x8x72xf32>
    %118 = vector.shape_cast %117 : vector<1x8x72xf32> to vector<8x72xf32>
    %cst_44 = arith.constant dense<0.000000e+00> : vector<8x256xf32>
    %119 = tpu.matmul %118, %28, %cst_44 {dimension_numbers = #tpu.dot_dimension_numbers<[1], [0], [0], [1], [0, 0, 1, 1], [], []>} : vector<8x72xf32>, vector<72x256xf32>, vector<8x256xf32> -> vector<8x256xf32>
    %cst_45 = arith.constant 0.000000e+00 : f32
    %120 = vector.broadcast %cst_45 : f32 to vector<8x256xf32>
    %121 = arith.maximumf %119, %120 : vector<8x256xf32>
    %c4_46 = arith.constant 4 : index
    %c0_47 = arith.constant 0 : index
    %c0_48 = arith.constant 0 : index
    %122 = vector.load %arg4[%c4_46, %c0_47, %c0_48] : memref<7x4x8xf32, #tpu.memory_space<vmem>>, vector<1x4x8xf32>
    %123 = vector.shape_cast %122 : vector<1x4x8xf32> to vector<4x8xf32>
    %cst_49 = arith.constant dense<0.000000e+00> : vector<4x256xf32>
    %124 = tpu.matmul %123, %121, %cst_49 {dimension_numbers = #tpu.dot_dimension_numbers<[1], [0], [0], [1], [0, 0, 1, 1], [], []>} : vector<4x8xf32>, vector<8x256xf32>, vector<4x256xf32> -> vector<4x256xf32>
    %125 = arith.addf %116, %124 : vector<4x256xf32>
    %126 = tpu.concatenate %5, %121, %5 in 1 : vector<8x128xf32>, vector<8x256xf32>, vector<8x128xf32> -> vector<8x512xf32>
    %127 = vector.extract_strided_slice %126 {offsets = [0, 111], sizes = [8, 256], strides = [1, 1]} : vector<8x512xf32> to vector<8x256xf32>
    %128 = vector.broadcast %3 : vector<1x256xf32> to vector<8x256xf32>
    %129 = arith.mulf %127, %128 : vector<8x256xf32>
    %130 = vector.extract_strided_slice %126 {offsets = [0, 112], sizes = [8, 256], strides = [1, 1]} : vector<8x512xf32> to vector<8x256xf32>
    %131 = vector.extract_strided_slice %126 {offsets = [0, 113], sizes = [8, 256], strides = [1, 1]} : vector<8x512xf32> to vector<8x256xf32>
    %132 = vector.broadcast %4 : vector<1x256xf32> to vector<8x256xf32>
    %133 = arith.mulf %131, %132 : vector<8x256xf32>
    %134 = vector.extract_strided_slice %126 {offsets = [0, 127], sizes = [8, 256], strides = [1, 1]} : vector<8x512xf32> to vector<8x256xf32>
    %135 = vector.broadcast %3 : vector<1x256xf32> to vector<8x256xf32>
    %136 = arith.mulf %134, %135 : vector<8x256xf32>
    %137 = vector.extract_strided_slice %126 {offsets = [0, 128], sizes = [8, 256], strides = [1, 1]} : vector<8x512xf32> to vector<8x256xf32>
    %138 = vector.extract_strided_slice %126 {offsets = [0, 129], sizes = [8, 256], strides = [1, 1]} : vector<8x512xf32> to vector<8x256xf32>
    %139 = vector.broadcast %4 : vector<1x256xf32> to vector<8x256xf32>
    %140 = arith.mulf %138, %139 : vector<8x256xf32>
    %141 = vector.extract_strided_slice %126 {offsets = [0, 143], sizes = [8, 256], strides = [1, 1]} : vector<8x512xf32> to vector<8x256xf32>
    %142 = vector.broadcast %3 : vector<1x256xf32> to vector<8x256xf32>
    %143 = arith.mulf %141, %142 : vector<8x256xf32>
    %144 = vector.extract_strided_slice %126 {offsets = [0, 144], sizes = [8, 256], strides = [1, 1]} : vector<8x512xf32> to vector<8x256xf32>
    %145 = vector.extract_strided_slice %126 {offsets = [0, 145], sizes = [8, 256], strides = [1, 1]} : vector<8x512xf32> to vector<8x256xf32>
    %146 = vector.broadcast %4 : vector<1x256xf32> to vector<8x256xf32>
    %147 = arith.mulf %145, %146 : vector<8x256xf32>
    %148 = tpu.concatenate %129, %130, %133, %136, %137, %140, %143, %144, %147 in 0 : vector<8x256xf32>, vector<8x256xf32>, vector<8x256xf32>, vector<8x256xf32>, vector<8x256xf32>, vector<8x256xf32>, vector<8x256xf32>, vector<8x256xf32>, vector<8x256xf32> -> vector<72x256xf32>
    %c7 = arith.constant 7 : index
    %c0_50 = arith.constant 0 : index
    %c0_51 = arith.constant 0 : index
    %149 = vector.load %arg3[%c7, %c0_50, %c0_51] : memref<12x8x72xf32, #tpu.memory_space<vmem>>, vector<1x8x72xf32>
    %150 = vector.shape_cast %149 : vector<1x8x72xf32> to vector<8x72xf32>
    %cst_52 = arith.constant dense<0.000000e+00> : vector<8x256xf32>
    %151 = tpu.matmul %150, %28, %cst_52 {dimension_numbers = #tpu.dot_dimension_numbers<[1], [0], [0], [1], [0, 0, 1, 1], [], []>} : vector<8x72xf32>, vector<72x256xf32>, vector<8x256xf32> -> vector<8x256xf32>
    %c8 = arith.constant 8 : index
    %c0_53 = arith.constant 0 : index
    %c0_54 = arith.constant 0 : index
    %152 = vector.load %arg3[%c8, %c0_53, %c0_54] : memref<12x8x72xf32, #tpu.memory_space<vmem>>, vector<1x8x72xf32>
    %153 = vector.shape_cast %152 : vector<1x8x72xf32> to vector<8x72xf32>
    %cst_55 = arith.constant dense<0.000000e+00> : vector<8x256xf32>
    %154 = tpu.matmul %153, %148, %cst_55 {dimension_numbers = #tpu.dot_dimension_numbers<[1], [0], [0], [1], [0, 0, 1, 1], [], []>} : vector<8x72xf32>, vector<72x256xf32>, vector<8x256xf32> -> vector<8x256xf32>
    %155 = arith.addf %151, %154 : vector<8x256xf32>
    %cst_56 = arith.constant 0.000000e+00 : f32
    %156 = vector.broadcast %cst_56 : f32 to vector<8x256xf32>
    %157 = arith.maximumf %155, %156 : vector<8x256xf32>
    %c5_57 = arith.constant 5 : index
    %c0_58 = arith.constant 0 : index
    %c0_59 = arith.constant 0 : index
    %158 = vector.load %arg4[%c5_57, %c0_58, %c0_59] : memref<7x4x8xf32, #tpu.memory_space<vmem>>, vector<1x4x8xf32>
    %159 = vector.shape_cast %158 : vector<1x4x8xf32> to vector<4x8xf32>
    %cst_60 = arith.constant dense<0.000000e+00> : vector<4x256xf32>
    %160 = tpu.matmul %159, %157, %cst_60 {dimension_numbers = #tpu.dot_dimension_numbers<[1], [0], [0], [1], [0, 0, 1, 1], [], []>} : vector<4x8xf32>, vector<8x256xf32>, vector<4x256xf32> -> vector<4x256xf32>
    %161 = arith.addf %125, %160 : vector<4x256xf32>
    %162 = tpu.concatenate %5, %157, %5 in 1 : vector<8x128xf32>, vector<8x256xf32>, vector<8x128xf32> -> vector<8x512xf32>
    %163 = vector.extract_strided_slice %162 {offsets = [0, 111], sizes = [8, 256], strides = [1, 1]} : vector<8x512xf32> to vector<8x256xf32>
    %164 = vector.broadcast %3 : vector<1x256xf32> to vector<8x256xf32>
    %165 = arith.mulf %163, %164 : vector<8x256xf32>
    %166 = vector.extract_strided_slice %162 {offsets = [0, 112], sizes = [8, 256], strides = [1, 1]} : vector<8x512xf32> to vector<8x256xf32>
    %167 = vector.extract_strided_slice %162 {offsets = [0, 113], sizes = [8, 256], strides = [1, 1]} : vector<8x512xf32> to vector<8x256xf32>
    %168 = vector.broadcast %4 : vector<1x256xf32> to vector<8x256xf32>
    %169 = arith.mulf %167, %168 : vector<8x256xf32>
    %170 = vector.extract_strided_slice %162 {offsets = [0, 127], sizes = [8, 256], strides = [1, 1]} : vector<8x512xf32> to vector<8x256xf32>
    %171 = vector.broadcast %3 : vector<1x256xf32> to vector<8x256xf32>
    %172 = arith.mulf %170, %171 : vector<8x256xf32>
    %173 = vector.extract_strided_slice %162 {offsets = [0, 128], sizes = [8, 256], strides = [1, 1]} : vector<8x512xf32> to vector<8x256xf32>
    %174 = vector.extract_strided_slice %162 {offsets = [0, 129], sizes = [8, 256], strides = [1, 1]} : vector<8x512xf32> to vector<8x256xf32>
    %175 = vector.broadcast %4 : vector<1x256xf32> to vector<8x256xf32>
    %176 = arith.mulf %174, %175 : vector<8x256xf32>
    %177 = vector.extract_strided_slice %162 {offsets = [0, 143], sizes = [8, 256], strides = [1, 1]} : vector<8x512xf32> to vector<8x256xf32>
    %178 = vector.broadcast %3 : vector<1x256xf32> to vector<8x256xf32>
    %179 = arith.mulf %177, %178 : vector<8x256xf32>
    %180 = vector.extract_strided_slice %162 {offsets = [0, 144], sizes = [8, 256], strides = [1, 1]} : vector<8x512xf32> to vector<8x256xf32>
    %181 = vector.extract_strided_slice %162 {offsets = [0, 145], sizes = [8, 256], strides = [1, 1]} : vector<8x512xf32> to vector<8x256xf32>
    %182 = vector.broadcast %4 : vector<1x256xf32> to vector<8x256xf32>
    %183 = arith.mulf %181, %182 : vector<8x256xf32>
    %184 = tpu.concatenate %165, %166, %169, %172, %173, %176, %179, %180, %183 in 0 : vector<8x256xf32>, vector<8x256xf32>, vector<8x256xf32>, vector<8x256xf32>, vector<8x256xf32>, vector<8x256xf32>, vector<8x256xf32>, vector<8x256xf32>, vector<8x256xf32> -> vector<72x256xf32>
    %c9 = arith.constant 9 : index
    %c0_61 = arith.constant 0 : index
    %c0_62 = arith.constant 0 : index
    %185 = vector.load %arg3[%c9, %c0_61, %c0_62] : memref<12x8x72xf32, #tpu.memory_space<vmem>>, vector<1x8x72xf32>
    %186 = vector.shape_cast %185 : vector<1x8x72xf32> to vector<8x72xf32>
    %cst_63 = arith.constant dense<0.000000e+00> : vector<8x256xf32>
    %187 = tpu.matmul %186, %28, %cst_63 {dimension_numbers = #tpu.dot_dimension_numbers<[1], [0], [0], [1], [0, 0, 1, 1], [], []>} : vector<8x72xf32>, vector<72x256xf32>, vector<8x256xf32> -> vector<8x256xf32>
    %c10 = arith.constant 10 : index
    %c0_64 = arith.constant 0 : index
    %c0_65 = arith.constant 0 : index
    %188 = vector.load %arg3[%c10, %c0_64, %c0_65] : memref<12x8x72xf32, #tpu.memory_space<vmem>>, vector<1x8x72xf32>
    %189 = vector.shape_cast %188 : vector<1x8x72xf32> to vector<8x72xf32>
    %cst_66 = arith.constant dense<0.000000e+00> : vector<8x256xf32>
    %190 = tpu.matmul %189, %148, %cst_66 {dimension_numbers = #tpu.dot_dimension_numbers<[1], [0], [0], [1], [0, 0, 1, 1], [], []>} : vector<8x72xf32>, vector<72x256xf32>, vector<8x256xf32> -> vector<8x256xf32>
    %191 = arith.addf %187, %190 : vector<8x256xf32>
    %c11 = arith.constant 11 : index
    %c0_67 = arith.constant 0 : index
    %c0_68 = arith.constant 0 : index
    %192 = vector.load %arg3[%c11, %c0_67, %c0_68] : memref<12x8x72xf32, #tpu.memory_space<vmem>>, vector<1x8x72xf32>
    %193 = vector.shape_cast %192 : vector<1x8x72xf32> to vector<8x72xf32>
    %cst_69 = arith.constant dense<0.000000e+00> : vector<8x256xf32>
    %194 = tpu.matmul %193, %184, %cst_69 {dimension_numbers = #tpu.dot_dimension_numbers<[1], [0], [0], [1], [0, 0, 1, 1], [], []>} : vector<8x72xf32>, vector<72x256xf32>, vector<8x256xf32> -> vector<8x256xf32>
    %195 = arith.addf %191, %194 : vector<8x256xf32>
    %cst_70 = arith.constant 0.000000e+00 : f32
    %196 = vector.broadcast %cst_70 : f32 to vector<8x256xf32>
    %197 = arith.maximumf %195, %196 : vector<8x256xf32>
    %c6_71 = arith.constant 6 : index
    %c0_72 = arith.constant 0 : index
    %c0_73 = arith.constant 0 : index
    %198 = vector.load %arg4[%c6_71, %c0_72, %c0_73] : memref<7x4x8xf32, #tpu.memory_space<vmem>>, vector<1x4x8xf32>
    %199 = vector.shape_cast %198 : vector<1x4x8xf32> to vector<4x8xf32>
    %cst_74 = arith.constant dense<0.000000e+00> : vector<4x256xf32>
    %200 = tpu.matmul %199, %197, %cst_74 {dimension_numbers = #tpu.dot_dimension_numbers<[1], [0], [0], [1], [0, 0, 1, 1], [], []>} : vector<4x8xf32>, vector<8x256xf32>, vector<4x256xf32> -> vector<4x256xf32>
    %201 = arith.addf %161, %200 : vector<4x256xf32>
    %c0_75 = arith.constant 0 : index
    %c0_76 = arith.constant 0 : index
    %c0_77 = arith.constant 0 : index
    %202 = vector.load %arg5[%c0_75, %c0_76, %c0_77] : memref<1x4x256xf32, #tpu.memory_space<vmem>>, vector<1x4x256xf32>
    %203 = vector.shape_cast %202 : vector<1x4x256xf32> to vector<4x256xf32>
    %204 = vector.shape_cast %201 : vector<4x256xf32> to vector<1x4x256xf32>
    tpu.vector_store %arg5[%c0_75, %c0_76, %c0_77], %204 {strides = array<i32>} : memref<1x4x256xf32, #tpu.memory_space<vmem>>, vector<1x4x256xf32>,
    return
  }
  func.func @transform_0(%arg0: i32) -> (i32, i32, i32) {
    %c0_i32 = arith.constant 0 : i32
    %c0_i32_0 = arith.constant 0 : i32
    %c0_i32_1 = arith.constant 0 : i32
    return %arg0, %c0_i32, %c0_i32_0 : i32, i32, i32
  }
  func.func @transform_1(%arg0: i32) -> (i32, i32) {
    %c0_i32 = arith.constant 0 : i32
    %c0_i32_0 = arith.constant 0 : i32
    %c0_i32_1 = arith.constant 0 : i32
    return %c0_i32, %c0_i32_0 : i32, i32
  }
  func.func @transform_2(%arg0: i32) -> (i32, i32, i32) {
    %c0_i32 = arith.constant 0 : i32
    %c0_i32_0 = arith.constant 0 : i32
    %c0_i32_1 = arith.constant 0 : i32
    %c0_i32_2 = arith.constant 0 : i32
    return %c0_i32, %c0_i32_0, %c0_i32_1 : i32, i32, i32
  }
  func.func @transform_3(%arg0: i32) -> (i32, i32, i32) {
    %c0_i32 = arith.constant 0 : i32
    %c0_i32_0 = arith.constant 0 : i32
    %c0_i32_1 = arith.constant 0 : i32
    %c0_i32_2 = arith.constant 0 : i32
    return %c0_i32, %c0_i32_0, %c0_i32_1 : i32, i32, i32
  }
  func.func @transform_4(%arg0: i32) -> (i32, i32, i32) {
    %c0_i32 = arith.constant 0 : i32
    %c0_i32_0 = arith.constant 0 : i32
    %c0_i32_1 = arith.constant 0 : i32
    return %arg0, %c0_i32, %c0_i32_0 : i32, i32, i32
  }
}

</mosaic_0001>

<bundles_post_ra>
// kernel: tpu_custom_call.1
= control target key start
LH: loop header
LB: loop body
LE: loop exit
PB: predicated region body
PF: predicated region fallthrough
CT: control target
= control target key end

     0   :  { %9 = vsyncpa [#allocation3], 0  ;;  %s4701_s0 = inlined_call_operand.hbm [shape: f32[2,8,256], index: 0, kind: input, shape index: {}]   ;;  %s4702_s1 = inlined_call_operand.hbm [shape: f32[2,256], index: 1, kind: input, shape index: {}]   ;;  %s4703_s2 = inlined_call_operand.hbm [shape: f32[12,8,72], index: 2, kind: input, shape index: {}]   ;;  %s4704_s3 = inlined_call_operand.hbm [shape: f32[7,4,8], index: 3, kind: input, shape index: {}]   ;;  %s4705_s4 = inlined_call_operand.hbm [shape: f32[2,4,256], index: 4, kind: output, shape index: {}]  }
   0x1   :  { %11 = vsyncpa [#allocation3 + $0x1], 0 }
   0x2   :  { %12 = vsyncpa [#allocation6], 0 }
   0x3   :  { %13 = vsyncpa [#allocation9], 0 }
   0x4   :  { %14 = vsyncpa [#allocation4], 0 }
   0x5   :  { %16 = vsyncpa [#allocation4 + $0x1], 0  ;;  %s3826_s15 = smov 0   ;;  %s3828_s16 = smov 0  }
   0x6   :  { %s3830_s17 = smov 0   ;;  %s3832_s18 = smov 0  }
   0x7 LB: > { %s3847_s19 = sadd.s32 4294967295, %s3777_s18   ;;  %s2783_s20 = sadd.s32 4294967294, %s3777_s18   ;;  %s3777_s18 = sphi %s3832_s18, %s4728_s18   ;;  %s3773_s17 = sphi %s3830_s17, %s4727_s17   ;;  %s3769_s16 = sphi %s3828_s16, %s4726_s16   ;;  %s3765_s15 = sphi %s3826_s15, %s4725_s15  }
   0x8   : > { %p42_p0 = scmp.ne.s32.totalorder %s3769_s16, %s3765_s15  ;;  %p4706_p1 = scmp.eq.s32.totalorder %s3847_s19, 0 }
   0x9   : > { %p135_p3 = scmp.eq.s32.totalorder %s2783_s20, 1  ;;  %p2784_p5 = scmp.ge.s32.totalorder %s3777_s18, 1 }
   0xa   : > { %p3856_p4 = por %p4706_p1, %p42_p0  ;;  %p142_p7 = scmp.lt.s32.totalorder %s3777_s18, 3 }
   0xb   : > { %p3861_p6 = por %p135_p3, %p42_p0  ;;  %s3779_s24 = smov [#allocation5]  }
   0xc   : > { %s4709_s21 = scalar_select %p3856_p4, 1, 0 }
   0xd   : > { %s4710_s22 = scalar_select %p3861_p6, 1, 0 }
   0xe   : > { %p3866_p8 = pnand %p2784_p5, %p142_p7  ;;  %s155_s25 = sshll.u32 %s3779_s24, 4  ;;  %s156_s25 = int_to_ptr.vmem [resolvable:$true] %s155_s25 }
   0xf   : > { %s3780_s26 = smov [#allocation7]   ;;  %s3781_s29 = smov [#allocation8]  }
  0x10   : > { %s4711_s23 = scalar_select %p3866_p8, 1, 0 }
  0x11   : > { %p3056_p10 = pneg %p3866_p8  ;;  %s165_s27 = sshll.u32 %s3780_s26, 4  ;;  %s3879_s27 = int_to_ptr.vmem [resolvable:$true] %s165_s27 }
  0x12   : > { %s3881_s30 = sshll.u32 %s3781_s29, 4  ;;  %s3589_s7 = scalar_lea.hbm %s4702_s1, 64  ;;  %s179_s30 = int_to_ptr.vmem [resolvable:$true] %s3881_s30 }
  0x13   : > { %p3875_p11 = pnand %p3056_p10, %p4706_p1  ;;  %p3590_p12 = scmp.ne.s32.totalorder %s4702_s1, %s3589_s7 }
  0x14   : > { %p3596_p5 = scmp.lt.u32.totalorder %s3589_s7, %s4702_s1 }
  0x15   : > { %p3891_p13 = pneg %p3875_p11 }
  0x17   : > { %p3592_p0 = pnand %p3891_p13, %p3590_p12 }
  0x19   : > { %p3593_p3 = pneg %p3592_p0 }
  0x1b   : > { %p3598_p7 = pnand %p3596_p5, %p3593_p3 }
  0x1d   : > { %3601 = shalt.err (!%p3598_p7)
}
  0x1e   : > { %s3602_s13 = scalar_lea.vmem %s156_s25, 64  ;;  %p3610_p2 = scmp.lt.s32.totalorder %s156_s25, %s156_s25 }
  0x1f   : > { %p3603_p10 = scmp.ne.s32.totalorder %s156_s25, %s3602_s13  ;;  %p3611_p6 = scmp.lt.s32.totalorder %s3602_s13, %s3602_s13 }
  0x21   : > { %p3605_p9 = pnand %p3603_p10, %p3891_p13  ;;  %p3612_p4 = por %p3611_p6, %p3610_p2 }
  0x23   : > { %p3606_p1 = pneg %p3605_p9 }
  0x25   : > { %p3613_p8 = pnand %p3612_p4, %p3606_p1 }
  0x27   : > { %3616 = shalt.err (!%p3613_p8)
}
  0x28   : > { %3059 = dma.hbm_to_vmem [thread:$0]  (!%p3875_p11), %s4702_s1, 64, %s156_s25, [#allocation6]  }
  0x29   : > { %s3617_s29 = scalar_lea.hbm %s4703_s2, 1536 }
  0x2a   : > { %p3618_p9 = scmp.ne.s32.totalorder %s4703_s2, %s3617_s29  ;;  %p3624_p1 = scmp.lt.u32.totalorder %s3617_s29, %s4703_s2 }
  0x2c   : > { %p3620_p12 = pnand %p3618_p9, %p3891_p13 }
  0x2e   : > { %p3621_p2 = pneg %p3620_p12 }
  0x30   : > { %p3626_p4 = pnand %p3624_p1, %p3621_p2 }
  0x32   : > { %3629 = shalt.err (!%p3626_p4)
}
  0x33   : > { %s3630_s25 = scalar_lea.vmem %s3879_s27, 1536  ;;  %p3638_p3 = scmp.lt.s32.totalorder %s3879_s27, %s3879_s27 }
  0x34   : > { %p3631_p6 = scmp.ne.s32.totalorder %s3879_s27, %s3630_s25  ;;  %p3639_p5 = scmp.lt.s32.totalorder %s3630_s25, %s3630_s25 }
  0x36   : > { %p3633_p8 = pnand %p3631_p6, %p3891_p13  ;;  %p3640_p7 = por %p3639_p5, %p3638_p3 }
  0x38   : > { %p3634_p0 = pneg %p3633_p8 }
  0x3a   : > { %p3641_p10 = pnand %p3640_p7, %p3634_p0 }
  0x3c   : > { %3644 = shalt.err (!%p3641_p10)
}
  0x3d   : > { %s3782_s9 = smov 128   ;;  %s3783_s11 = smov 8  }
  0x3e   : > { %3062 = dma.hbm_to_vmem [thread:$0]  (!%p3875_p11), %s4703_s2, 1536, %s3879_s27, [#allocation6], %s3782_s9, %s3782_s9, %s3783_s11  }
  0x3f   : > { %s3645_s24 = scalar_lea.hbm %s4704_s3, 448 }
  0x40   : > { %p3646_p9 = scmp.ne.s32.totalorder %s4704_s3, %s3645_s24  ;;  %p3652_p1 = scmp.lt.u32.totalorder %s3645_s24, %s4704_s3 }
  0x42   : > { %p3648_p12 = pnand %p3646_p9, %p3891_p13 }
  0x44   : > { %p3649_p2 = pneg %p3648_p12 }
  0x46   : > { %p3654_p4 = pnand %p3652_p1, %p3649_p2 }
  0x48   : > { %3657 = shalt.err (!%p3654_p4)
}
  0x49   : > { %s3658_s7 = scalar_lea.vmem %s179_s30, 448  ;;  %p3666_p3 = scmp.lt.s32.totalorder %s179_s30, %s179_s30 }
  0x4a   : > { %p3659_p6 = scmp.ne.s32.totalorder %s179_s30, %s3658_s7  ;;  %p3667_p5 = scmp.lt.s32.totalorder %s3658_s7, %s3658_s7 }
  0x4c   : > { %p3661_p8 = pnand %p3659_p6, %p3891_p13  ;;  %p3668_p7 = por %p3667_p5, %p3666_p3 }
  0x4e   : > { %p3662_p0 = pneg %p3661_p8 }
  0x50   : > { %p3669_p10 = pnand %p3668_p7, %p3662_p0 }
  0x52   : > { %3672 = shalt.err (!%p3669_p10)
}
  0x53   : > { %s3784_s27 = smov 64   ;;  %s3785_s10 = smov 4  }
  0x54   : > { %3065 = dma.hbm_to_vmem [thread:$0]  (!%p3875_p11), %s4704_s3, 448, %s179_s30, [#allocation9], %s3784_s27, %s3784_s27, %s3785_s10  }
  0x55   : > { %s3950_s9 = sadd.s32 1, %s3777_s18   ;;  %s29_s12 = sadd.s32 1, %s3773_s17 }
  0x56   : > { %s26_s11 = ssub.s32 %s3777_s18, %s3950_s9  ;;  %p36_p9 = scmp.ne.s32.totalorder %s3773_s17, %s3769_s16 }
  0x57   : > { %p27_p13 = scmp.eq.s32.totalorder %s26_s11, 0  ;;  %p37_p12 = scmp.eq.s32.totalorder %s3777_s18, 0 }
  0x58   : > { %p3077_p2 = scmp.lt.s32.totalorder %s3777_s18, 2  ;;  %p4714_p4 = scmp.eq.s32.totalorder %s3847_s19, 1 }
  0x59   : > { %s3960_s13 = scalar_select %p27_p13, %s3773_s17, %s29_s12  }
  0x5a   : > { %p38_p1 = por %p37_p12, %p36_p9  ;;  %p3964_p6 = por %p4714_p4, %p36_p9 }
  0x5b   : > { %s192_s28 = sand.u32 1, %s3773_s17   ;;  %s2822_s20 = sshll.u32 %s3777_s18, 8 }
  0x5c   : > { %s2789_s30 = sshll.u32 %s192_s28, 4  ;;  %s3973_s29 = scalar_lea.hbm %s4701_s0, %s2822_s20 }
  0x5d   : > { %s196_s5 = scalar_lea.vmem [#allocation2], %s2789_s30  ;;  %p3975_p11 = pnand %p3077_p2, %p38_p1 }
  0x5e   : > { %s204_s6 = sshll.u32 %s196_s5, 4  ;;  %s193_s27 = scalar_lea.sflag [#allocation3], %s192_s28  ;;  %s3979_s6 = int_to_ptr.vmem [resolvable:$true] %s204_s6 }
  0x5f   : > { %s3673_s10 = scalar_lea.hbm %s3973_s29, 256  ;;  %p3675_p0 = pneg %p3975_p11 }
  0x60   : > { %p3674_p8 = scmp.ne.s32.totalorder %s3973_s29, %s3673_s10  ;;  %s3678_s11 = scalar_lea.hbm %s4701_s0, 512 }
  0x61   : > { %p3679_p7 = scmp.lt.u32.totalorder %s3973_s29, %s4701_s0  ;;  %p3680_p10 = scmp.lt.u32.totalorder %s3678_s11, %s3673_s10 }
  0x62   : > { %p3676_p3 = pnand %p3675_p0, %p3674_p8  ;;  %p3682_p9 = scmp.lt.u32.totalorder %s3673_s10, %s3973_s29 }
  0x63   : > { %p3681_p13 = por %p3680_p10, %p3679_p7 }
  0x64   : > { %p3677_p5 = pneg %p3676_p3 }
  0x65   : > { %p3683_p12 = por %p3682_p9, %p3681_p13 }
  0x67   : > { %p3684_p2 = pnand %p3683_p12, %p3677_p5 }
  0x69   : > { %3687 = shalt.err (!%p3684_p2)
}
  0x6a   : > { %s3688_s28 = scalar_lea.vmem %s3979_s6, 256  ;;  %s3786_s30 = smov [#allocation2]  }
  0x6b   : > { %p3689_p1 = scmp.ne.s32.totalorder %s3979_s6, %s3688_s28  ;;  %s3693_s24 = sshll.u32 %s3786_s30, 4  ;;  %s3694_s24 = int_to_ptr.vmem [resolvable:$false] %s3693_s24 }
  0x6c   : > { %s3695_s26 = scalar_lea.vmem %s3694_s24, 512  ;;  %p3696_p3 = scmp.lt.s32.totalorder %s3979_s6, %s3694_s24 }
  0x6d   : > { %p3691_p4 = pnand %p3689_p1, %p3675_p0  ;;  %p3697_p7 = scmp.lt.s32.totalorder %s3695_s26, %s3688_s28 }
  0x6f   : > { %p3692_p8 = pneg %p3691_p4  ;;  %p3698_p10 = por %p3697_p7, %p3696_p3 }
  0x71   : > { %p3699_p13 = pnand %p3698_p10, %p3692_p8 }
  0x73   : > { %3702 = shalt.err (!%p3699_p13)
}
  0x74   : > { %3069 = dma.hbm_to_vmem [thread:$0]  (!%p3975_p11), %s3973_s29, 256, %s3979_s6, %s193_s27  }
  0x75   : > { %p4717_p5 = scmp.ne.s32.totalorder %s4711_s23, 0 }
  0x76   : > { %s4009_s5 = sand.u32 (!%p4717_p5), 1, %s3769_s16   ;;  %p4718_p0 = scmp.ne.s32.totalorder (!%p4717_p5), %s4709_s21, 0 }
  0x77   : > { %213 = sbr.rel (%p4717_p5) target bundleno = 3163 (0xc5b), region = 36  ;;  %s2793_s10 = sshll.u32 (!%p4717_p5), %s4009_s5, 4 }
  0x78   : > { %s216_s8 = scalar_lea.sflag (!%p4717_p5), [#allocation3], %s4009_s5  ;;  %s4013_s25 = scalar_lea.vmem (!%p4717_p5), [#allocation2], %s2793_s10 }
  0x7e   : > { %3748 = dma.done.wait (%p4718_p0), %s216_s8, 256  }
  0x7f   : > { %3750 = vsyncadd (%p4718_p0), %s216_s8, 4294967040  ;;  %p4719_p11 = scmp.eq.s32.totalorder %s3847_s19, 0 }
  0x81   : > { %3752 = dma.done.wait (%p4719_p11), [#allocation6], 1600   ;;  %p4720_p9 = pmov %p4719_p11 }
  0x83   : > { %3754 = vsyncadd (%p4720_p9), [#allocation6], 4294965696  ;;  %p4721_p12 = pmov %p4720_p9 }
  0x84   : > { %p4722_p2 = pmov %p4720_p9 }
  0x85   : > { %3756 = dma.done.wait (%p4721_p12), [#allocation9], 448  }
  0x86   : > { %3758 = vsyncadd (%p4722_p2), [#allocation9], 4294966848  ;;  %v260_v0 = vlaneseq  ;;  %v3787_v1 = vmov 0.0   ;;  %v258_v7 = vld [vmem:[#allocation5] sm:$0xf]  ;;  %s3788_s21 = smov 113  }
  0x87   : > { %620 = vmatprep.mubr.f32.mxu0 %v3787_v1  ;;  %699 = vmatprep.mubr.f32.mxu1 %v3787_v1  ;;  %s3789_s23 = smov 127   ;;  %s3790_s29 = smov 1   ;;  %v4034_v16 = vld [vmem:[%s4013_s25] sm:$0xff]  ;;  %v4037_v17 = vld [vmem:[%s4013_s25 + $0x8] sm:$0xff]  ;;  %vm328_vm0 = vcmask 1039360   ;;  %vm316_vm1 = vcmask 924672  }
  0x88   : > { %v261_v2 = vshrl.u32 %v260_v0, 7  ;;  %s3791_s6 = smov 15   ;;  %s3792_s7 = smov 17   ;;  %v3134_v18 = vpack.i.bf16 %v4037_v17, %v4034_v16  ;;  %vm340_vm2 = vcmask 7168   ;;  %vm352_vm3 = vcmask 121856  }
  0x89   : > { %s3793_s27 = smov 111   ;;  %s3794_s11 = smov 112   ;;  %vm364_vm4 = vcmask 138240   ;;  %vm284_vm5 = vcmask 908288   ;;  %vm404_vm6 = vcmask 916480   ;;  %vm392_vm7 = vcmask 1031168  }
  0x8a   : > { %v294_v3 = vsub.s32 1, %v261_v2  ;;  %v262_v4 = vsub.s32 0, %v261_v2  ;;  %v298_v5 = vsub.s32 3, %v261_v2  ;;  %v266_v6 = vsub.s32 2, %v261_v2  ;;  %s3795_s12 = smov 126   ;;  %s3796_s20 = smov 95  }
  0x8b   : > { %s3797_s28 = smov 110   ;;  %s3798_s30 = smov 96   ;;  %vm442_vm8 = vcmask 777216   ;;  %vm421_vm9 = vcmask 900096   ;;  %vm433_vm10 = vcmask 785408   ;;  %vm454_vm11 = vcmask 769024  }
  0x8c   : > { %v295_v8 = vrot.slane %v258_v7, %v294_v3  ;;  %v263_v9 = vrot.slane %v258_v7, %v262_v4  ;;  %v299_v10 = vrot.slane %v258_v7, %v298_v5  ;;  %v267_v11 = vrot.slane %v258_v7, %v266_v6  ;;  %s3799_s24 = smov 94   ;;  %s2797_s26 = sshll.u32 %s4009_s5, 3 }
  0x8d   : > { %vm552_vm12 = vcmask 588800   ;;  %vm631_vm13 = vcmask 64512   ;;  %s2823_s10 = sshll.u32 %s3847_s19, 7  ;;  %s255_s8 = scalar_lea.vmem [#allocation10], %s2797_s26 }
  0x8e   : > { %v305_v12 = vrot.slane %v295_v8, %v294_v3  ;;  %v273_v13 = vrot.slane %v263_v9, %v262_v4  ;;  %v309_v14 = vrot.slane %v299_v10, %v294_v3  ;;  %v277_v15 = vrot.slane %v267_v11, %v262_v4  ;;  %s2684_s25 = sshll.u32 %s255_s8, 4  ;;  %s3800_s19 = smov [#allocation10]   ;;  %s4659_s25 = int_to_ptr.vmem [resolvable:$true] %s2684_s25 }
  0x90   : > { %312 = vrot.lane.b32.xlu0 %v305_v12, %s3788_s21  ;;  %324 = vrot.lane.b32.xlu1 %v273_v13, %s3789_s23 }
  0x94   : > { %314 = vrot.lane.b32.xlu0 %v309_v14, %s3788_s21  ;;  %326 = vrot.lane.b32.xlu1 %v277_v15, %s3789_s23 }
  0x98   : > { %336 = vrot.lane.b32.xlu0 %v305_v12, %s3790_s29  ;;  %338 = vrot.lane.b32.xlu1 %v309_v14, %s3790_s29  ;;  %s4657_s29 = scalar_lea.hbm %s4705_s4, %s2823_s10 }
  0x9c   : > { %348 = vrot.lane.b32.xlu0 %v273_v13, %s3791_s6  ;;  %350 = vrot.lane.b32.xlu1 %v277_v15, %s3791_s6  ;;  %s2670_s6 = scalar_lea.sflag [#allocation4], %s4009_s5 }
  0xa0   : > { %360 = vrot.lane.b32.xlu0 %v305_v12, %s3792_s7  ;;  %362 = vrot.lane.b32.xlu1 %v309_v14, %s3792_s7 }
  0xa4   : > { %280 = vrot.lane.b32.xlu0 %v273_v13, %s3793_s27  ;;  %282 = vrot.lane.b32.xlu1 %v277_v15, %s3793_s27 }
  0xa8   : > { %3135 = vrot.lane.b32.xlu0 %v3134_v18, %s3789_s23  ;;  %375 = vrot.lane.b32.xlu1 %v3787_v1, %s3789_s23 }
  0xac   : > { %3140 = vrot.lane.b32.xlu0 %v3134_v18, %s3793_s27 }
 0x102   : > { %v313_v19 = vpop.permute.xlu0 %312  ;;  %v325_v20 = vpop.permute.xlu1 %324 }
 0x103   : > { %v321_v21 = vmul.f32 0.0, %v313_v19  ;;  %v333_v22 = vmul.f32 0.0, %v325_v20 }
 0x105   : > { %398 = vrot.lane.b32.xlu1 %v333_v22, %s3794_s11  ;;  %386 = vrot.lane.b32.xlu0 %v321_v21, %s3795_s12 }
 0x106   : > { %v4049_v23 = vpop.permute.xlu0 %314  ;;  %v4051_v24 = vpop.permute.xlu1 %326 }
 0x107   : > { %v4055_v25 = vsel %vm328_vm0, %v325_v20, %v4051_v24  ;;  %v335_v26 = vmul.f32 %v4051_v24, %v4037_v17  ;;  %v4062_v28 = vsel %vm316_vm1, %v313_v19, %v4049_v23  ;;  %v323_v32 = vmul.f32 %v4049_v23, %v4037_v17 }
 0x108   : > { %v334_v27 = vmul.f32 %v4055_v25, %v4034_v16  ;;  %v322_v36 = vmul.f32 %v4062_v28, %v4034_v16 }
 0x109   : > { %3150 = vrot.lane.b32.xlu1 %v3134_v18, %s3796_s20 }
 0x10a   : > { %v4065_v29 = vpop.permute.xlu0 %336  ;;  %v339_v30 = vpop.permute.xlu1 %338  ;;  %v3154_v31 = vpack.i.bf16 %v335_v26, %v334_v27  ;;  %v3144_v42 = vpack.i.bf16 %v323_v32, %v322_v36 }
 0x10b   : > { %v4070_v33 = vsel %vm340_vm2, %v4065_v29, %v339_v30  ;;  %v347_v34 = vmul.f32 0.0, %v339_v30  ;;  %v345_v35 = vmul.f32 %v4065_v29, %v4034_v16 }
 0x10c   : > { %v346_v37 = vmul.f32 %v4070_v33, %v4037_v17 }
 0x10d   : > { %419 = vrot.lane.b32.xlu0 %v347_v34, %s3797_s28  ;;  %3155 = vrot.lane.b32.xlu1 %v3154_v31, %s3794_s11 }
 0x10e   : > { %v4080_v38 = vpop.permute.xlu0 %348  ;;  %v351_v39 = vpop.permute.xlu1 %350  ;;  %v3159_v40 = vpack.i.bf16 %v346_v37, %v345_v35 }
 0x10f   : > { %v4083_v41 = vsel %vm352_vm3, %v4080_v38, %v351_v39  ;;  %v357_v43 = vmul.f32 %v4080_v38, %v4034_v16  ;;  %v359_v45 = vmul.f32 0.0, %v351_v39 }
 0x110   : > { %v358_v44 = vmul.f32 %v4083_v41, %v4037_v17 }
 0x111   : > { %3160 = vrot.lane.b32.xlu1 %v3159_v40, %s3797_s28  ;;  %3145 = vrot.lane.b32.xlu0 %v3144_v42, %s3795_s12 }
 0x112   : > { %v3164_v46 = vpack.i.bf16 %v358_v44, %v357_v43  ;;  %v4091_v47 = vpop.permute.xlu0 %360  ;;  %v363_v48 = vpop.permute.xlu1 %362 }
 0x113   : > { %v369_v49 = vmul.f32 %v4091_v47, %v4034_v16  ;;  %v4099_v50 = vsel %vm364_vm4, %v4091_v47, %v363_v48  ;;  %v371_v53 = vmul.f32 0.0, %v363_v48 }
 0x114   : > { %v370_v54 = vmul.f32 %v4099_v50, %v4037_v17 }
 0x115   : > { %3165 = vrot.lane.b32.xlu1 %v3164_v46, %s3798_s30  ;;  %431 = vrot.lane.b32.xlu0 %v359_v45, %s3798_s30 }
 0x116   : > { %v281_v51 = vpop.permute.xlu0 %280  ;;  %v4101_v52 = vpop.permute.xlu1 %282 }
 0x117   : > { %v289_v55 = vmul.f32 0.0, %v281_v51  ;;  %v4117_v2 = vsel %vm284_vm5, %v281_v51, %v4101_v52  ;;  %v291_v7 = vmul.f32 %v4101_v52, %v4037_v17 }
 0x118   : > { %v290_v6 = vmul.f32 %v4117_v2, %v4034_v16 }
 0x119   : > { %440 = vrot.lane.b32.xlu0 %v3787_v1, %s3796_s20  ;;  %448 = vrot.lane.b32.xlu1 %v369_v49, %s3799_s24 }
 0x11a   : > { %v3136_v56 = vpop.permute.xlu0 %3135  ;;  %v4108_v57 = vpop.permute.xlu1 %375  ;;  %v3184_v9 = vpack.i.bf16 %v291_v7, %v290_v6 }
 0x11b   : > { %v3138_v58 = vunpack.i.h.bf16 %v3136_v56  ;;  %v3137_v59 = vunpack.i.l.bf16 %v3136_v56 }
 0x11d   : > { %450 = vrot.lane.b32.xlu0 %v370_v54, %s3799_s24  ;;  %452 = vrot.lane.b32.xlu1 %v371_v53, %s3799_s24  ;;  %v381_v60 = vsel %vm328_vm0, %v4108_v57, %v3137_v59  ;;  %v382_v61 = vsel %vm328_vm0, %v3137_v59, %v3138_v58 }
 0x11e   : > { %v3141_v62 = vpop.permute.xlu0 %3140  ;;  %v3174_v63 = vpack.i.bf16 %v381_v60, %v289_v55  ;;  %v3169_v0 = vpack.i.bf16 %v3138_v58, %v382_v61 }
 0x11f   : > { %v3143_v3 = vunpack.i.h.bf16 %v3141_v62  ;;  %v3142_v4 = vunpack.i.l.bf16 %v3141_v62 }
 0x121   : > { %3175 = vrot.lane.b32.xlu0 %v3174_v63, %s3792_s7  ;;  %v411_v5 = vsel %vm284_vm5, %v3142_v4, %v3143_v3  ;;  %3170 = vrot.lane.b32.xlu1 %v3169_v0, %s3792_s7 }
 0x122   : > { %v3179_v8 = vpack.i.bf16 %v3143_v3, %v411_v5 }
 0x125   : > { %3180 = vrot.lane.b32.xlu0 %v3179_v8, %s3792_s7 }
 0x129   : > { %3185 = vrot.lane.b32.xlu0 %v3184_v9, %s3792_s7 }
 0x177   : > { %v4128_v10 = vpop.permute.xlu1 %398  ;;  %v4130_v11 = vpop.permute.xlu0 %386 }
 0x17b   : > { %v3151_v12 = vpop.permute.xlu1 %3150 }
 0x17c   : > { %v3153_v34 = vunpack.i.h.bf16 %v3151_v12  ;;  %v3152_v35 = vunpack.i.l.bf16 %v3151_v12 }
 0x17e   : > { %v443_v46 = vsel %vm442_vm8, %v3152_v35, %v3153_v34 }
 0x17f   : > { %v4132_v13 = vpop.permute.xlu0 %419  ;;  %v3156_v14 = vpop.permute.xlu1 %3155 }
 0x180   : > { %v3158_v15 = vunpack.i.h.bf16 %v3156_v14  ;;  %v3157_v18 = vunpack.i.l.bf16 %v3156_v14 }
 0x182   : > { %v406_v19 = vsel %vm404_vm6, %v3157_v18, %v3158_v15  ;;  %v405_v43 = vsel %vm404_vm6, %v4128_v10, %v3157_v18 }
 0x183   : > { %v3161_v20 = vpop.permute.xlu1 %3160  ;;  %v3146_v21 = vpop.permute.xlu0 %3145  ;;  %v3194_v22 = vpack.i.bf16 %v3158_v15, %v406_v19 }
 0x184   : > { %v3162_v26 = vunpack.i.l.bf16 %v3161_v20  ;;  %v3148_v27 = vunpack.i.h.bf16 %v3146_v21  ;;  %v3147_v30 = vunpack.i.l.bf16 %v3146_v21  ;;  %v3163_v40 = vunpack.i.h.bf16 %v3161_v20 }
 0x185   : > { %3195 = vrot.lane.b32.xlu0 %v3194_v22, %s3792_s7 }
 0x186   : > { %v394_v31 = vsel %vm392_vm7, %v3147_v30, %v3148_v27  ;;  %v3199_v32 = vpack.i.bf16 %v3162_v26, %v3142_v4  ;;  %v393_v42 = vsel %vm392_vm7, %v4130_v11, %v3147_v30  ;;  %v422_v53 = vsel %vm421_vm9, %v3162_v26, %v3163_v40 }
 0x187   : > { %v3166_v36 = vpop.permute.xlu1 %3165  ;;  %v4137_v37 = vpop.permute.xlu0 %431  ;;  %v3189_v39 = vpack.i.bf16 %v3148_v27, %v394_v31  ;;  %v3209_v45 = vpack.i.bf16 %v405_v43, %v393_v42  ;;  %v423_v54 = vsel %vm421_vm9, %v3163_v40, %v4132_v13 }
 0x188   : > { %v3168_v49 = vunpack.i.h.bf16 %v3166_v36  ;;  %v3167_v56 = vunpack.i.l.bf16 %v3166_v36  ;;  %v3214_v58 = vpack.i.bf16 %v423_v54, %v422_v53 }
 0x189   : > { %3190 = vrot.lane.b32.xlu1 %v3189_v39, %s3792_s7  ;;  %3200 = vrot.lane.b32.xlu0 %v3199_v32, %s3792_s7 }
 0x18a   : > { %v434_v60 = vsel %vm433_vm10, %v3167_v56, %v3168_v49  ;;  %v435_v61 = vsel %vm433_vm10, %v3168_v49, %v4137_v37  ;;  %v3224_v5 = vpack.i.bf16 %v3152_v35, %v3167_v56 }
 0x18b   : > { %v4145_v44 = vpop.permute.xlu0 %440  ;;  %v449_v48 = vpop.permute.xlu1 %448  ;;  %v3219_v0 = vpack.i.bf16 %v435_v61, %v434_v60 }
 0x18c   : > { %v444_v51 = vsel %vm442_vm8, %v3153_v34, %v4145_v44 }
 0x18d   : > { %3210 = vrot.lane.b32.xlu1 %v3209_v45, %s3792_s7  ;;  %v3204_v55 = vpack.i.bf16 %v444_v51, %v443_v46 }
 0x18f   : > { %3205 = vrot.lane.b32.xlu0 %v3204_v55, %s3792_s7  ;;  %v451_v59 = vpop.permute.xlu0 %450  ;;  %v4160_v63 = vpop.permute.xlu1 %452 }
 0x190   : > { %v455_v62 = vsel %vm454_vm11, %v449_v48, %v451_v59  ;;  %v456_v12 = vsel %vm454_vm11, %v451_v59, %v4160_v63 }
 0x191   : > { %3215 = vrot.lane.b32.xlu1 %v3214_v58, %s3792_s7 }
 0x193   : > { %512 = vrot.lane.b32.xlu0 %v455_v62, %s3792_s7  ;;  %v3176_v3 = vpop.permute.xlu0 %3175  ;;  %v3171_v4 = vpop.permute.xlu1 %3170 }
 0x194   : > { %v3178_v7 = vunpack.i.h.bf16 %v3176_v3  ;;  %v3173_v8 = vunpack.i.h.bf16 %v3171_v4  ;;  %v3172_v9 = vunpack.i.l.bf16 %v3171_v4  ;;  %v4168_v14 = vunpack.i.l.bf16 %v3176_v3 }
 0x195   : > { %3220 = vrot.lane.b32.xlu1 %v3219_v0, %s3792_s7 }
 0x196   : > { %v518_v18 = vsel %vm364_vm4, %v3178_v7, %v3172_v9  ;;  %v519_v19 = vsel %vm364_vm4, %v3172_v9, %v3173_v8 }
 0x197   : > { %510 = vrot.lane.b32.xlu0 %v449_v48, %s3792_s7  ;;  %v3181_v6 = vpop.permute.xlu0 %3180 }
 0x198   : > { %v3183_v51 = vunpack.i.h.bf16 %v3181_v6  ;;  %v3182_v53 = vunpack.i.l.bf16 %v3181_v6 }
 0x199   : > { %3225 = vrot.lane.b32.xlu1 %v3224_v5, %s3792_s7 }
 0x19a   : > { %v525_v3 = vsel %vm364_vm4, %v3182_v53, %v3183_v51 }
 0x19b   : > { %v3186_v15 = vpop.permute.xlu0 %3185 }
 0x19c   : > { %v3188_v20 = vunpack.i.h.bf16 %v3186_v15  ;;  %v3187_v21 = vunpack.i.l.bf16 %v3186_v15 }
 0x19d   : > { %514 = vrot.lane.b32.xlu1 %v456_v12, %s3792_s7 }
 0x19e   : > { %v516_v22 = vsel %vm364_vm4, %v4168_v14, %v3187_v21  ;;  %v517_v26 = vsel %vm364_vm4, %v3187_v21, %v3188_v20 }
 0x19f   : > { %v4176_v27 = vpack.c.bf16 %v519_v19, %v517_v26  ;;  %v4178_v30 = vpack.c.bf16 %v518_v18, %v516_v22 }
 0x1a1   : > { %2825 = vmatprep.subr.bf16.mxu0 %v4176_v27 }
 0x1a2   : > { %2827 = vmatpush1.bf16.msra.mxu0 %v4178_v30 }
 0x1f7   : > { %v3196_v31 = vpop.permute.xlu0 %3195 }
 0x1f8   : > { %v3198_v32 = vunpack.i.h.bf16 %v3196_v31  ;;  %v3197_v34 = vunpack.i.l.bf16 %v3196_v31 }
 0x1fa   : > { %v523_v40 = vsel %vm364_vm4, %v3197_v34, %v3198_v32 }
 0x1fb   : > { %v3191_v35 = vpop.permute.xlu1 %3190  ;;  %v3201_v43 = vpop.permute.xlu0 %3200 }
 0x1fc   : > { %v3193_v36 = vunpack.i.h.bf16 %v3191_v35  ;;  %v3192_v39 = vunpack.i.l.bf16 %v3191_v35  ;;  %v3202_v54 = vunpack.i.l.bf16 %v3201_v43  ;;  %v3203_v61 = vunpack.i.h.bf16 %v3201_v43 }
 0x1fe   : > { %v521_v42 = vsel %vm364_vm4, %v3192_v39, %v3193_v36  ;;  %v524_v4 = vsel %vm364_vm4, %v3202_v54, %v3182_v53 }
 0x1ff   : > { %v4184_v45 = vpack.c.bf16 %v523_v40, %v521_v42  ;;  %v3211_v46 = vpop.permute.xlu1 %3210 }
 0x200   : > { %v3213_v48 = vunpack.i.h.bf16 %v3211_v46  ;;  %v3212_v49 = vunpack.i.l.bf16 %v3211_v46  ;;  %v458_v46 = vld [vmem:[#allocation7] sm:$0xff] }
 0x201   : > { %2829 = vmatprep.subr.bf16.mxu0 %v4184_v45  ;;  %v3206_v59 = vpop.permute.xlu0 %3205 }
 0x202   : > { %v520_v55 = vsel %vm364_vm4, %v3212_v49, %v3192_v39  ;;  %v522_v56 = vsel %vm364_vm4, %v3213_v48, %v3197_v34  ;;  %v3208_v5 = vunpack.i.h.bf16 %v3206_v59  ;;  %v3207_v6 = vunpack.i.l.bf16 %v3206_v59 }
 0x203   : > { %v4189_v58 = vpack.c.bf16 %v522_v56, %v520_v55  ;;  %v3216_v60 = vpop.permute.xlu1 %3215  ;;  %v630_v55 = vld [vmem:[#allocation8 + $0x4] sm:$0xf] }
 0x204   : > { %v3218_v62 = vunpack.i.h.bf16 %v3216_v60  ;;  %v3217_v0 = vunpack.i.l.bf16 %v3216_v60  ;;  %v531_v20 = vsel %vm364_vm4, %v3207_v6, %v3208_v5 }
 0x205   : > { %2831 = vmatpush1.bf16.msra.mxu0 %v4189_v58  ;;  %v513_v26 = vpop.permute.xlu0 %512 }
 0x206   : > { %v526_v7 = vsel %vm364_vm4, %v3203_v61, %v3217_v0  ;;  %v527_v8 = vsel %vm364_vm4, %v3217_v0, %v3218_v62 }
 0x207   : > { %v4196_v9 = vpack.c.bf16 %v527_v8, %v525_v3  ;;  %v4198_v12 = vpack.c.bf16 %v526_v7, %v524_v4  ;;  %v3221_v15 = vpop.permute.xlu1 %3220 }
 0x208   : > { %v3223_v18 = vunpack.i.h.bf16 %v3221_v15  ;;  %v3222_v19 = vunpack.i.l.bf16 %v3221_v15 }
 0x209   : > { %2833 = vmatprep.subr.bf16.mxu0 %v4196_v9  ;;  %v511_v43 = vpop.permute.xlu0 %510 }
 0x20a   : > { %v529_v21 = vsel %vm364_vm4, %v3222_v19, %v3223_v18  ;;  %2835 = vmatpush1.bf16.msra.mxu0 %v4198_v12  ;;  %v4217_v48 = vsel %vm364_vm4, %v511_v43, %v513_v26 }
 0x20b   : > { %v4204_v22 = vpack.c.bf16 %v531_v20, %v529_v21  ;;  %v3226_v31 = vpop.permute.xlu1 %3225  ;;  %v457_v21 = vld [vmem:[#allocation8] sm:$0xf] }
 0x20c   : > { %v3228_v32 = vunpack.i.h.bf16 %v3226_v31  ;;  %v3227_v34 = vunpack.i.l.bf16 %v3226_v31 }
 0x20d   : > { %2837 = vmatprep.subr.bf16.mxu0 %v4204_v22 }
 0x20e   : > { %v528_v35 = vsel %vm364_vm4, %v3227_v34, %v3222_v19  ;;  %v530_v36 = vsel %vm364_vm4, %v3228_v32, %v3207_v6 }
 0x20f   : > { %v4209_v39 = vpack.c.bf16 %v530_v36, %v528_v35  ;;  %v515_v40 = vpop.permute.xlu1 %514 }
 0x210   : > { %v4212_v42 = vsel %vm364_vm4, %v513_v26, %v515_v40 }
 0x211   : > { %2839 = vmatpush1.bf16.msra.mxu0 %v4209_v39 }
 0x212   : > { %572 = vmatprep.subr.mxu0 %v4212_v42 }
 0x215   : > { %573 = vmatpush1.msra.mxu0 %v4217_v48 }
 0x216   : > { %2798 = vmatmul.mubr.msk.f32.vlgmr.msra.gmra.mrb[0].mxu0 %vm552_vm12, %v458_v46 }
 0x217   : > { %1012 = vmatprep.mubr.f32.mxu0 %v3787_v1 }
 0x2e9   : > { %v622_v49 = vpop.f32.mrb[0].mxu0 }
 0x2ea   : > { %v627_v51 = vmax.f32 %v622_v49, 0.0  ;;  %v624_v53 = vpop.f32.mrb[1].mxu0 }
 0x2eb   : > { %v628_v54 = vmax.f32 %v624_v53, 0.0 }
 0x2ec   : > { %v782_v56 = vmul.f32 %v627_v51, %v4062_v28  ;;  %v784_v59 = vmul.f32 %v627_v51, %v4055_v25  ;;  %v786_v60 = vmul.f32 %v627_v51, %v4065_v29  ;;  %v788_v61 = vmul.f32 %v627_v51, %v4080_v38 }
 0x2ed   : > { %635 = vmatprep.subr.mxu1 %v628_v54  ;;  %v3229_v62 = vpack.i.bf16 %v628_v54, %v627_v51  ;;  %v783_v0 = vmul.f32 %v628_v54, %v4049_v23  ;;  %v785_v3 = vmul.f32 %v628_v54, %v4051_v24  ;;  %v787_v4 = vmul.f32 %v628_v54, %v4070_v33 }
 0x2ee   : > { %636 = vmatpush1.msra.mxu1 %v627_v51  ;;  %v789_v5 = vmul.f32 %v628_v54, %v4083_v41  ;;  %v780_v18 = vmul.f32 %v627_v51, %v4117_v2  ;;  %v781_v19 = vmul.f32 %v628_v54, %v4101_v52 }
 0x2ef   : > { %3230 = vrot.lane.b32.xlu1 %v3229_v62, %s3789_s23  ;;  %2799 = vmatmul.mubr.msk.f32.vlgmr.msra.gmra.mrb[0].mxu1 %vm631_vm13, %v630_v55  ;;  %v3234_v6 = vpack.i.bf16 %v783_v0, %v782_v56  ;;  %v3244_v7 = vpack.i.bf16 %v785_v3, %v784_v59  ;;  %v3249_v8 = vpack.i.bf16 %v787_v4, %v786_v60 }
 0x2f0   : > { %709 = vmatprep.subr.mxu1 %v4037_v17  ;;  %773 = vmatprep.mubr.f32.mxu1 %v3787_v1  ;;  %v3254_v15 = vpack.i.bf16 %v789_v5, %v788_v61  ;;  %v3264_v20 = vpack.i.bf16 %v781_v19, %v780_v18  ;;  %v791_v17 = vmul.f32 %v628_v54, %v4099_v50 }
 0x2f1   : > { %710 = vmatpush1.msra.mxu1 %v4034_v16  ;;  %3235 = vrot.lane.b32.xlu0 %v3234_v6, %s3795_s12  ;;  %v790_v16 = vmul.f32 %v627_v51, %v4091_v47 }
 0x2f2   : > { %2857 = vmatprep.subr.bf16.mxu1 %v4176_v27 }
 0x2f3   : > { %3245 = vrot.lane.b32.xlu1 %v3244_v7, %s3794_s11 }
 0x2f5   : > { %3240 = vrot.lane.b32.xlu0 %v3229_v62, %s3793_s27 }
 0x2f7   : > { %3250 = vrot.lane.b32.xlu1 %v3249_v8, %s3797_s28  ;;  %2800 = vmatmul.mubr.msk.f32.vlgmr.msra.gmra.mrb[0].mxu1 %vm631_vm13, %v457_v21 }
 0x2f8   : > { %2859 = vmatpush1.bf16.msra.mxu1 %v4178_v30  ;;  %1086 = vmatprep.mubr.f32.mxu1 %v3787_v1 }
 0x2f9   : > { %2861 = vmatprep.subr.bf16.mxu1 %v4184_v45  ;;  %3255 = vrot.lane.b32.xlu0 %v3254_v15, %s3798_s30 }
 0x2fb   : > { %3260 = vrot.lane.b32.xlu1 %v3229_v62, %s3796_s20 }
 0x2fc   : > { %2863 = vmatpush1.bf16.msra.mxu1 %v4189_v58 }
 0x2fd   : > { %2865 = vmatprep.subr.bf16.mxu1 %v4196_v9  ;;  %845 = vrot.lane.b32.xlu0 %v790_v16, %s3799_s24 }
 0x2ff   : > { %847 = vrot.lane.b32.xlu1 %v791_v17, %s3799_s24 }
 0x300   : > { %2867 = vmatpush1.bf16.msra.mxu1 %v4198_v12 }
 0x301   : > { %2869 = vmatprep.subr.bf16.mxu1 %v4204_v22  ;;  %3265 = vrot.lane.b32.xlu0 %v3264_v20, %s3792_s7 }
 0x304   : > { %2871 = vmatpush1.bf16.msra.mxu1 %v4209_v39 }
 0x305   : > { %1038 = vmatprep.subr.mxu1 %v4212_v42 }
 0x308   : > { %1039 = vmatpush1.msra.mxu1 %v4217_v48 }
 0x361   : > { %v3231_v26 = vpop.permute.xlu1 %3230 }
 0x362   : > { %v3233_v31 = vunpack.i.h.bf16 %v3231_v26  ;;  %v3232_v32 = vunpack.i.l.bf16 %v3231_v26 }
 0x363   : > { %v3236_v34 = vpop.permute.xlu0 %3235 }
 0x364   : > { %v799_v35 = vsel %vm328_vm0, %v3232_v32, %v3233_v31  ;;  %v3237_v36 = vunpack.i.l.bf16 %v3236_v34  ;;  %v3238_v43 = vunpack.i.h.bf16 %v3236_v34  ;;  %v798_v7 = vsel %vm328_vm0, %v4108_v57, %v3232_v32 }
 0x365   : > { %v3269_v40 = vpack.i.bf16 %v3233_v31, %v799_v35  ;;  %v3246_v46 = vpop.permute.xlu1 %3245 }
 0x366   : > { %v3248_v49 = vunpack.i.h.bf16 %v3246_v46  ;;  %v3247_v51 = vunpack.i.l.bf16 %v3246_v46  ;;  %v806_v53 = vsel %vm392_vm7, %v4130_v11, %v3237_v36  ;;  %v807_v61 = vsel %vm392_vm7, %v3237_v36, %v3238_v43 }
 0x367   : > { %3270 = vrot.lane.b32.xlu1 %v3269_v40, %s3792_s7  ;;  %v3241_v54 = vpop.permute.xlu0 %3240  ;;  %v3284_v8 = vpack.i.bf16 %v807_v61, %v798_v7 }
 0x368   : > { %v3274_v55 = vpack.i.bf16 %v806_v53, %v3248_v49  ;;  %v3243_v56 = vunpack.i.h.bf16 %v3241_v54  ;;  %v3242_v59 = vunpack.i.l.bf16 %v3241_v54  ;;  %v814_v3 = vsel %vm404_vm6, %v4128_v10, %v3247_v51 }
 0x369   : > { %v3251_v60 = vpop.permute.xlu1 %3250  ;;  %v815_v15 = vsel %vm404_vm6, %v3247_v51, %v3248_v49  ;;  %v852_v51 = vld [vmem:[#allocation7 + $0x8] sm:$0xff] }
 0x36a   : > { %v3253_v62 = vunpack.i.h.bf16 %v3251_v60  ;;  %v3252_v0 = vunpack.i.l.bf16 %v3251_v60  ;;  %3275 = vrot.lane.b32.xlu0 %v3274_v55, %s3792_s7  ;;  %v820_v4 = vsel %vm284_vm5, %v3242_v59, %v3243_v56  ;;  %v3289_v16 = vpack.i.bf16 %v815_v15, %v3238_v43  ;;  %2802 = vmatmul.mubr.msk.f32.vlgmr.msra.gmra.mrb[2].mxu1 %vm552_vm12, %v852_v51 }
 0x36b   : > { %v3256_v5 = vpop.permute.xlu0 %3255  ;;  %v3279_v6 = vpack.i.bf16 %v820_v4, %v814_v3  ;;  %1164 = vmatprep.mubr.f32.mxu1 %v3787_v1 }
 0x36c   : > { %v3258_v18 = vunpack.i.h.bf16 %v3256_v5  ;;  %v3257_v19 = vunpack.i.l.bf16 %v3256_v5  ;;  %v827_v21 = vsel %vm421_vm9, %v3252_v0, %v3253_v62  ;;  %v828_v34 = vsel %vm421_vm9, %v3253_v62, %v4132_v13 }
 0x36d   : > { %v3261_v20 = vpop.permute.xlu1 %3260  ;;  %3280 = vrot.lane.b32.xlu1 %v3279_v6, %s3792_s7  ;;  %v3294_v31 = vpack.i.bf16 %v827_v21, %v3243_v56  ;;  %v3299_v35 = vpack.i.bf16 %v3242_v59, %v828_v34 }
 0x36e   : > { %3285 = vrot.lane.b32.xlu0 %v3284_v8, %s3792_s7  ;;  %v3263_v17 = vunpack.i.h.bf16 %v3261_v20  ;;  %v3262_v26 = vunpack.i.l.bf16 %v3261_v20  ;;  %v835_v32 = vsel %vm433_vm10, %v3257_v19, %v3258_v18  ;;  %v836_v46 = vsel %vm433_vm10, %v3258_v18, %v4137_v37 }
 0x36f   : > { %v3304_v36 = vpack.i.bf16 %v835_v32, %v3252_v0  ;;  %v846_v55 = vpop.permute.xlu0 %845 }
 0x370   : > { %v841_v40 = vsel %vm442_vm8, %v3262_v26, %v3263_v17  ;;  %v842_v43 = vsel %vm442_vm8, %v3263_v17, %v4145_v44 }
 0x371   : > { %3290 = vrot.lane.b32.xlu1 %v3289_v16, %s3792_s7  ;;  %v3314_v49 = vpack.i.bf16 %v841_v40, %v836_v46  ;;  %v3309_v53 = vpack.i.bf16 %v3257_v19, %v842_v43  ;;  %v848_v54 = vpop.permute.xlu1 %847 }
 0x372   : > { %3295 = vrot.lane.b32.xlu0 %v3294_v31, %s3792_s7  ;;  %v849_v56 = vsel %vm454_vm11, %v846_v55, %v848_v54  ;;  %v850_v59 = vsel %vm454_vm11, %v848_v54, %v4160_v63 }
 0x373   : > { %v3266_v60 = vpop.permute.xlu0 %3265 }
 0x374   : > { %v3268_v61 = vunpack.i.h.bf16 %v3266_v60  ;;  %v3267_v62 = vunpack.i.l.bf16 %v3266_v60 }
 0x375   : > { %3300 = vrot.lane.b32.xlu1 %v3299_v35, %s3792_s7 }
 0x376   : > { %3305 = vrot.lane.b32.xlu0 %v3304_v36, %s3792_s7  ;;  %v910_v6 = vsel %vm364_vm4, %v3267_v62, %v3268_v61  ;;  %v909_v21 = vsel %vm364_vm4, %v4168_v14, %v3267_v62 }
 0x379   : > { %3315 = vrot.lane.b32.xlu1 %v3314_v49, %s3792_s7 }
 0x37a   : > { %3310 = vrot.lane.b32.xlu0 %v3309_v53, %s3792_s7 }
 0x37d   : > { %897 = vrot.lane.b32.xlu1 %v3262_v26, %s3792_s7 }
 0x37e   : > { %905 = vrot.lane.b32.xlu0 %v849_v56, %s3792_s7 }
 0x381   : > { %907 = vrot.lane.b32.xlu1 %v850_v59, %s3792_s7 }
 0x382   : > { %903 = vrot.lane.b32.xlu0 %v846_v55, %s3792_s7 }
 0x3d9   : > { %v3271_v0 = vpop.permute.xlu1 %3270 }
 0x3da   : > { %v3273_v3 = vunpack.i.h.bf16 %v3271_v0  ;;  %v3272_v4 = vunpack.i.l.bf16 %v3271_v0 }
 0x3dc   : > { %v3276_v5 = vpop.permute.xlu0 %3275  ;;  %v912_v7 = vsel %vm364_vm4, %v3272_v4, %v3273_v3 }
 0x3dd   : > { %v4300_v8 = vpack.c.bf16 %v912_v7, %v910_v6  ;;  %v3278_v16 = vunpack.i.h.bf16 %v3276_v5  ;;  %v3277_v17 = vunpack.i.l.bf16 %v3276_v5 }
 0x3df   : > { %v3281_v15 = vpop.permute.xlu1 %3280  ;;  %2841 = vmatprep.subr.bf16.mxu0 %v4300_v8 }
 0x3e0   : > { %v3286_v18 = vpop.permute.xlu0 %3285  ;;  %v3282_v34 = vunpack.i.l.bf16 %v3281_v15  ;;  %v3283_v59 = vunpack.i.h.bf16 %v3281_v15 }
 0x3e1   : > { %v3288_v19 = vunpack.i.h.bf16 %v3286_v18  ;;  %v3287_v20 = vunpack.i.l.bf16 %v3286_v18 }
 0x3e3   : > { %v911_v26 = vsel %vm364_vm4, %v3287_v20, %v3272_v4  ;;  %v3291_v31 = vpop.permute.xlu1 %3290  ;;  %v913_v43 = vsel %vm364_vm4, %v3278_v16, %v3288_v19 }
 0x3e4   : > { %v2842_v32 = vpack.c.bf16 %v911_v26, %v909_v21  ;;  %v3293_v35 = vunpack.i.h.bf16 %v3291_v31  ;;  %v3292_v36 = vunpack.i.l.bf16 %v3291_v31  ;;  %v3296_v40 = vpop.permute.xlu0 %3295 }
 0x3e5   : > { %v3297_v49 = vunpack.i.l.bf16 %v3296_v40  ;;  %v3298_v60 = vunpack.i.h.bf16 %v3296_v40 }
 0x3e6   : > { %v915_v46 = vsel %vm364_vm4, %v3282_v34, %v3293_v35  ;;  %2843 = vmatpush1.bf16.msra.mxu0 %v2842_v32  ;;  %v914_v51 = vsel %vm364_vm4, %v3288_v19, %v3292_v36  ;;  %v916_v53 = vsel %vm364_vm4, %v3293_v35, %v3277_v17 }
 0x3e7   : > { %v2846_v54 = vpack.c.bf16 %v915_v46, %v913_v43  ;;  %v3301_v55 = vpop.permute.xlu1 %3300  ;;  %v2844_v56 = vpack.c.bf16 %v916_v53, %v914_v51  ;;  %v918_v5 = vsel %vm364_vm4, %v3283_v59, %v3297_v49 }
 0x3e8   : > { %v3303_v61 = vunpack.i.h.bf16 %v3301_v55  ;;  %v3302_v62 = vunpack.i.l.bf16 %v3301_v55  ;;  %v3306_v0 = vpop.permute.xlu0 %3305 }
 0x3e9   : > { %v3307_v3 = vunpack.i.l.bf16 %v3306_v0  ;;  %2845 = vmatprep.subr.bf16.mxu0 %v2844_v56  ;;  %v3308_v20 = vunpack.i.h.bf16 %v3306_v0 }
 0x3ea   : > { %v917_v4 = vsel %vm364_vm4, %v3303_v61, %v3283_v59  ;;  %2847 = vmatpush1.bf16.msra.mxu0 %v2846_v54  ;;  %v920_v6 = vsel %vm364_vm4, %v3298_v60, %v3302_v62  ;;  %v854_v61 = vld [vmem:[#allocation7 + $0x10] sm:$0xff]  ;;  %v1247_v62 = vld [vmem:[#allocation7 + $0x20] sm:$0xff] }
 0x3eb   : > { %v919_v7 = vsel %vm364_vm4, %v3307_v3, %v3298_v60  ;;  %v3316_v18 = vpop.permute.xlu1 %3315  ;;  %v2848_v19 = vpack.c.bf16 %v920_v6, %v918_v5 }
 0x3ec   : > { %v2850_v21 = vpack.c.bf16 %v919_v7, %v917_v4  ;;  %v3318_v15 = vunpack.i.h.bf16 %v3316_v18  ;;  %v3317_v16 = vunpack.i.l.bf16 %v3316_v18  ;;  %v3311_v17 = vpop.permute.xlu0 %3310 }
 0x3ed   : > { %v3313_v26 = vunpack.i.h.bf16 %v3311_v17  ;;  %v3312_v31 = vunpack.i.l.bf16 %v3311_v17  ;;  %2849 = vmatprep.subr.bf16.mxu0 %v2848_v19 }
 0x3ee   : > { %2851 = vmatpush1.bf16.msra.mxu0 %v2850_v21  ;;  %v922_v34 = vsel %vm364_vm4, %v3308_v20, %v3317_v16 }
 0x3ef   : > { %v898_v35 = vpop.permute.xlu1 %897  ;;  %v921_v36 = vsel %vm364_vm4, %v3313_v26, %v3308_v20  ;;  %v924_v40 = vsel %vm364_vm4, %v3318_v15, %v3312_v31 }
 0x3f0   : > { %v923_v43 = vsel %vm364_vm4, %v898_v35, %v3318_v15  ;;  %v906_v46 = vpop.permute.xlu0 %905  ;;  %v2852_v49 = vpack.c.bf16 %v924_v40, %v922_v34 }
 0x3f1   : > { %v2854_v51 = vpack.c.bf16 %v923_v43, %v921_v36 }
 0x3f2   : > { %2853 = vmatprep.subr.bf16.mxu0 %v2852_v49 }
 0x3f3   : > { %v908_v53 = vpop.permute.xlu1 %907  ;;  %2855 = vmatpush1.bf16.msra.mxu0 %v2854_v51 }
 0x3f4   : > { %v904_v55 = vpop.permute.xlu0 %903  ;;  %v926_v59 = vsel %vm364_vm4, %v906_v46, %v908_v53 }
 0x3f5   : > { %v925_v60 = vsel %vm364_vm4, %v904_v55, %v906_v46  ;;  %964 = vmatprep.subr.mxu0 %v926_v59 }
 0x3f7   : > { %965 = vmatpush1.msra.mxu0 %v925_v60 }
 0x3f8   : > { %2801 = vmatmul.mubr.msk.f32.vlgmr.msra.gmra.mrb[2].mxu0 %vm552_vm12, %v854_v61  ;;  %2873 = vmatprep.subr.bf16.mxu0 %v4300_v8 }
 0x3f9   : > { %2875 = vmatpush1.bf16.msra.mxu0 %v2842_v32  ;;  %1315 = vmatprep.mubr.f32.mxu0 %v3787_v1 }
 0x3fa   : > { %2877 = vmatprep.subr.bf16.mxu0 %v2844_v56 }
 0x3fd   : > { %2879 = vmatpush1.bf16.msra.mxu0 %v2846_v54 }
 0x3fe   : > { %2881 = vmatprep.subr.bf16.mxu0 %v2848_v19 }
 0x401   : > { %2883 = vmatpush1.bf16.msra.mxu0 %v2850_v21 }
 0x402   : > { %2885 = vmatprep.subr.bf16.mxu0 %v2852_v49 }
 0x405   : > { %2887 = vmatpush1.bf16.msra.mxu0 %v2854_v51 }
 0x406   : > { %1267 = vmatprep.subr.mxu0 %v926_v59 }
 0x409   : > { %1268 = vmatpush1.msra.mxu0 %v925_v60 }
 0x40a   : > { %2889 = vmatprep.subr.bf16.mxu0 %v4176_v27  ;;  %2804 = vmatmul.mubr.msk.f32.vlgmr.msra.gmra.mrb[4].mxu0 %vm552_vm12, %v1247_v62 }
 0x40b   : > { %2891 = vmatpush1.bf16.msra.mxu0 %v4178_v30  ;;  %1389 = vmatprep.mubr.f32.mxu0 %v3787_v1 }
 0x40c   : > { %2893 = vmatprep.subr.bf16.mxu0 %v4184_v45 }
 0x40f   : > { %2895 = vmatpush1.bf16.msra.mxu0 %v4189_v58 }
 0x410   : > { %2897 = vmatprep.subr.bf16.mxu0 %v4196_v9 }
 0x413   : > { %2899 = vmatpush1.bf16.msra.mxu0 %v4198_v12 }
 0x414   : > { %2901 = vmatprep.subr.bf16.mxu0 %v4204_v22 }
 0x417   : > { %2903 = vmatpush1.bf16.msra.mxu0 %v4209_v39 }
 0x418   : > { %1341 = vmatprep.subr.mxu0 %v4212_v42 }
 0x41b   : > { %1342 = vmatpush1.msra.mxu0 %v4217_v48 }
 0x43d   : > { %v1088_v8 = vpop.f32.mrb[2].mxu1 }
 0x43e   : > { %v1090_v32 = vpop.f32.mrb[3].mxu1 }
 0x4cb   : > { %v1014_v54 = vpop.f32.mrb[2].mxu0 }
 0x4cc   : > { %v1089_v56 = vadd.f32 %v1088_v8, %v1014_v54  ;;  %v1016_v0 = vpop.f32.mrb[3].mxu0 }
 0x4cd   : > { %v1091_v3 = vadd.f32 %v1090_v32, %v1016_v0 }
 0x4ce   : > { %v1093_v4 = vmax.f32 %v1089_v56, 0.0 }
 0x4cf   : > { %v1094_v5 = vmax.f32 %v1091_v3, 0.0 }
 0x4d0   : > { %v1175_v6 = vmul.f32 %v1093_v4, %v4062_v28  ;;  %v1177_v7 = vmul.f32 %v1093_v4, %v4055_v25  ;;  %v1179_v18 = vmul.f32 %v1093_v4, %v4065_v29  ;;  %v1181_v19 = vmul.f32 %v1093_v4, %v4080_v38 }
 0x4d1   : > { %1100 = vmatprep.subr.mxu1 %v1094_v5  ;;  %v3319_v20 = vpack.i.bf16 %v1094_v5, %v1093_v4  ;;  %v1176_v21 = vmul.f32 %v1094_v5, %v4049_v23  ;;  %v1178_v15 = vmul.f32 %v1094_v5, %v4051_v24  ;;  %v1180_v16 = vmul.f32 %v1094_v5, %v4070_v33 }
 0x4d2   : > { %1101 = vmatpush1.msra.mxu1 %v1093_v4  ;;  %v1182_v17 = vmul.f32 %v1094_v5, %v4083_v41  ;;  %v1173_v34 = vmul.f32 %v1093_v4, %v4117_v2  ;;  %v1174_v40 = vmul.f32 %v1094_v5, %v4101_v52  ;;  %v1183_v46 = vmul.f32 %v1093_v4, %v4091_v47  ;;  %v1245_v4 = vld [vmem:[#allocation7 + $0x18] sm:$0xff] }
 0x4d3   : > { %3320 = vrot.lane.b32.xlu1 %v3319_v20, %s3789_s23  ;;  %v3324_v26 = vpack.i.bf16 %v1176_v21, %v1175_v6  ;;  %v3334_v31 = vpack.i.bf16 %v1178_v15, %v1177_v7  ;;  %v3339_v35 = vpack.i.bf16 %v1180_v16, %v1179_v18  ;;  %v1184_v49 = vmul.f32 %v1094_v5, %v4099_v50 }
 0x4d4   : > { %v3344_v36 = vpack.i.bf16 %v1182_v17, %v1181_v19  ;;  %v3354_v43 = vpack.i.bf16 %v1174_v40, %v1173_v34  ;;  %2805 = vmatmul.mubr.msk.f32.vlgmr.msra.gmra.mrb[4].mxu0 %vm552_vm12, %v1245_v4 }
 0x4d5   : > { %3325 = vrot.lane.b32.xlu0 %v3324_v26, %s3795_s12  ;;  %1555 = vmatprep.mubr.f32.mxu0 %v3787_v1 }
 0x4d7   : > { %3335 = vrot.lane.b32.xlu1 %v3334_v31, %s3794_s11 }
 0x4d9   : > { %3330 = vrot.lane.b32.xlu0 %v3319_v20, %s3793_s27 }
 0x4db   : > { %3340 = vrot.lane.b32.xlu1 %v3339_v35, %s3797_s28 }
 0x4dd   : > { %3345 = vrot.lane.b32.xlu0 %v3344_v36, %s3798_s30 }
 0x4df   : > { %3350 = vrot.lane.b32.xlu1 %v3319_v20, %s3796_s20 }
 0x4e1   : > { %1238 = vrot.lane.b32.xlu0 %v1183_v46, %s3799_s24 }
 0x4e3   : > { %1240 = vrot.lane.b32.xlu1 %v1184_v49, %s3799_s24 }
 0x4e5   : > { %3355 = vrot.lane.b32.xlu0 %v3354_v43, %s3792_s7 }
 0x545   : > { %v3321_v51 = vpop.permute.xlu1 %3320 }
 0x546   : > { %v3323_v53 = vunpack.i.h.bf16 %v3321_v51  ;;  %v3322_v55 = vunpack.i.l.bf16 %v3321_v51 }
 0x547   : > { %v3326_v59 = vpop.permute.xlu0 %3325 }
 0x548   : > { %v1192_v60 = vsel %vm328_vm0, %v3322_v55, %v3323_v53  ;;  %v3327_v61 = vunpack.i.l.bf16 %v3326_v59  ;;  %v3328_v8 = vunpack.i.h.bf16 %v3326_v59  ;;  %v1191_v31 = vsel %vm328_vm0, %v4108_v57, %v3322_v55 }
 0x549   : > { %v3359_v62 = vpack.i.bf16 %v3323_v53, %v1192_v60  ;;  %v3336_v32 = vpop.permute.xlu1 %3335 }
 0x54a   : > { %v3338_v54 = vunpack.i.h.bf16 %v3336_v32  ;;  %v3337_v56 = vunpack.i.l.bf16 %v3336_v32  ;;  %v1199_v0 = vsel %vm392_vm7, %v4130_v11, %v3327_v61  ;;  %v1200_v19 = vsel %vm392_vm7, %v3327_v61, %v3328_v8 }
 0x54b   : > { %3360 = vrot.lane.b32.xlu1 %v3359_v62, %s3792_s7  ;;  %v3331_v3 = vpop.permute.xlu0 %3330  ;;  %v3374_v34 = vpack.i.bf16 %v1200_v19, %v1191_v31 }
 0x54c   : > { %v3364_v5 = vpack.i.bf16 %v1199_v0, %v3338_v54  ;;  %v3333_v6 = vunpack.i.h.bf16 %v3331_v3  ;;  %v3332_v7 = vunpack.i.l.bf16 %v3331_v3  ;;  %v1207_v15 = vsel %vm404_vm6, %v4128_v10, %v3337_v56  ;;  %v1096_v3 = vld [vmem:[#allocation8 + $0x8] sm:$0xf] }
 0x54d   : > { %v3341_v18 = vpop.permute.xlu1 %3340  ;;  %v1208_v35 = vsel %vm404_vm6, %v3337_v56, %v3338_v54  ;;  %2803 = vmatmul.mubr.msk.f32.vlgmr.msra.gmra.mrb[0].mxu1 %vm631_vm13, %v1096_v3 }
 0x54e   : > { %v3343_v20 = vunpack.i.h.bf16 %v3341_v18  ;;  %v3342_v21 = vunpack.i.l.bf16 %v3341_v18  ;;  %3365 = vrot.lane.b32.xlu0 %v3364_v5, %s3792_s7  ;;  %v1213_v16 = vsel %vm284_vm5, %v3332_v7, %v3333_v6  ;;  %v3379_v49 = vpack.i.bf16 %v1208_v35, %v3328_v8  ;;  %1635 = vmatprep.mubr.f32.mxu1 %v3787_v1 }
 0x54f   : > { %v3346_v17 = vpop.permute.xlu0 %3345  ;;  %v3369_v26 = vpack.i.bf16 %v1213_v16, %v1207_v15 }
 0x550   : > { %v3348_v36 = vunpack.i.h.bf16 %v3346_v17  ;;  %v3347_v40 = vunpack.i.l.bf16 %v3346_v17  ;;  %v1220_v46 = vsel %vm421_vm9, %v3342_v21, %v3343_v20  ;;  %v1221_v60 = vsel %vm421_vm9, %v3343_v20, %v4132_v13 }
 0x551   : > { %v3351_v43 = vpop.permute.xlu1 %3350  ;;  %3370 = vrot.lane.b32.xlu1 %v3369_v26, %s3792_s7  ;;  %v3384_v59 = vpack.i.bf16 %v1220_v46, %v3333_v6  ;;  %v3389_v61 = vpack.i.bf16 %v3332_v7, %v1221_v60 }
 0x552   : > { %3375 = vrot.lane.b32.xlu0 %v3374_v34, %s3792_s7  ;;  %v3353_v51 = vunpack.i.h.bf16 %v3351_v43  ;;  %v3352_v53 = vunpack.i.l.bf16 %v3351_v43  ;;  %v1228_v55 = vsel %vm433_vm10, %v3347_v40, %v3348_v36  ;;  %v1229_v54 = vsel %vm433_vm10, %v3348_v36, %v4137_v37 }
 0x553   : > { %v3394_v62 = vpack.i.bf16 %v1228_v55, %v3342_v21  ;;  %v1239_v5 = vpop.permute.xlu0 %1238 }
 0x554   : > { %v1234_v32 = vsel %vm442_vm8, %v3352_v53, %v3353_v51  ;;  %v1235_v8 = vsel %vm442_vm8, %v3353_v51, %v4145_v44 }
 0x555   : > { %3380 = vrot.lane.b32.xlu1 %v3379_v49, %s3792_s7  ;;  %v3404_v56 = vpack.i.bf16 %v1234_v32, %v1229_v54  ;;  %v3399_v0 = vpack.i.bf16 %v3347_v40, %v1235_v8  ;;  %v1241_v4 = vpop.permute.xlu1 %1240 }
 0x556   : > { %3385 = vrot.lane.b32.xlu0 %v3384_v59, %s3792_s7  ;;  %v1242_v6 = vsel %vm454_vm11, %v1239_v5, %v1241_v4  ;;  %v1243_v7 = vsel %vm454_vm11, %v1241_v4, %v4160_v63 }
 0x557   : > { %v3356_v18 = vpop.permute.xlu0 %3355 }
 0x558   : > { %v3358_v19 = vunpack.i.h.bf16 %v3356_v18  ;;  %v3357_v20 = vunpack.i.l.bf16 %v3356_v18 }
 0x559   : > { %3390 = vrot.lane.b32.xlu1 %v3389_v61, %s3792_s7 }
 0x55a   : > { %3395 = vrot.lane.b32.xlu0 %v3394_v62, %s3792_s7  ;;  %v1453_v26 = vsel %vm364_vm4, %v3357_v20, %v3358_v19  ;;  %v1452_v46 = vsel %vm364_vm4, %v4168_v14, %v3357_v20 }
 0x55d   : > { %3405 = vrot.lane.b32.xlu1 %v3404_v56, %s3792_s7 }
 0x55e   : > { %3400 = vrot.lane.b32.xlu0 %v3399_v0, %s3792_s7 }
 0x561   : > { %1440 = vrot.lane.b32.xlu1 %v3352_v53, %s3792_s7 }
 0x562   : > { %1448 = vrot.lane.b32.xlu0 %v1242_v6, %s3792_s7 }
 0x565   : > { %1450 = vrot.lane.b32.xlu1 %v1243_v7, %s3792_s7 }
 0x566   : > { %1446 = vrot.lane.b32.xlu0 %v1239_v5, %s3792_s7 }
 0x5bd   : > { %v3361_v21 = vpop.permute.xlu1 %3360 }
 0x5be   : > { %v3363_v15 = vunpack.i.h.bf16 %v3361_v21  ;;  %v3362_v16 = vunpack.i.l.bf16 %v3361_v21 }
 0x5c0   : > { %v3366_v17 = vpop.permute.xlu0 %3365  ;;  %v1455_v31 = vsel %vm364_vm4, %v3362_v16, %v3363_v15 }
 0x5c1   : > { %v2904_v34 = vpack.c.bf16 %v1455_v31, %v1453_v26  ;;  %v3368_v49 = vunpack.i.h.bf16 %v3366_v17  ;;  %v3367_v51 = vunpack.i.l.bf16 %v3366_v17 }
 0x5c3   : > { %v3371_v35 = vpop.permute.xlu1 %3370  ;;  %2905 = vmatprep.subr.bf16.mxu0 %v2904_v34 }
 0x5c4   : > { %v3376_v36 = vpop.permute.xlu0 %3375  ;;  %v3372_v60 = vunpack.i.l.bf16 %v3371_v35  ;;  %v3373_v7 = vunpack.i.h.bf16 %v3371_v35 }
 0x5c5   : > { %v3378_v40 = vunpack.i.h.bf16 %v3376_v36  ;;  %v3377_v43 = vunpack.i.l.bf16 %v3376_v36 }
 0x5c7   : > { %v1454_v53 = vsel %vm364_vm4, %v3377_v43, %v3362_v16  ;;  %v3381_v59 = vpop.permute.xlu1 %3380  ;;  %v1456_v8 = vsel %vm364_vm4, %v3368_v49, %v3378_v40 }
 0x5c8   : > { %v2906_v55 = vpack.c.bf16 %v1454_v53, %v1452_v46  ;;  %v3383_v61 = vunpack.i.h.bf16 %v3381_v59  ;;  %v3382_v62 = vunpack.i.l.bf16 %v3381_v59  ;;  %v3386_v32 = vpop.permute.xlu0 %3385 }
 0x5c9   : > { %v3387_v56 = vunpack.i.l.bf16 %v3386_v32  ;;  %v3388_v18 = vunpack.i.h.bf16 %v3386_v32 }
 0x5ca   : > { %v1458_v54 = vsel %vm364_vm4, %v3372_v60, %v3383_v61  ;;  %2907 = vmatpush1.bf16.msra.mxu0 %v2906_v55  ;;  %v1457_v0 = vsel %vm364_vm4, %v3378_v40, %v3382_v62  ;;  %v1459_v3 = vsel %vm364_vm4, %v3383_v61, %v3367_v51 }
 0x5cb   : > { %v2910_v4 = vpack.c.bf16 %v1458_v54, %v1456_v8  ;;  %v3391_v5 = vpop.permute.xlu1 %3390  ;;  %v2908_v6 = vpack.c.bf16 %v1459_v3, %v1457_v0  ;;  %v1461_v17 = vsel %vm364_vm4, %v3373_v7, %v3387_v56 }
 0x5cc   : > { %v3393_v19 = vunpack.i.h.bf16 %v3391_v5  ;;  %v3392_v20 = vunpack.i.l.bf16 %v3391_v5  ;;  %v3396_v21 = vpop.permute.xlu0 %3395  ;;  %v1397_v5 = vld [vmem:[#allocation7 + $0x28] sm:$0xff] }
 0x5cd   : > { %v3397_v15 = vunpack.i.l.bf16 %v3396_v21  ;;  %2909 = vmatprep.subr.bf16.mxu0 %v2908_v6  ;;  %v3398_v40 = vunpack.i.h.bf16 %v3396_v21  ;;  %v1645_v21 = vld [vmem:[#allocation7 + $0x30] sm:$0xff] }
 0x5ce   : > { %v1460_v16 = vsel %vm364_vm4, %v3393_v19, %v3373_v7  ;;  %2911 = vmatpush1.bf16.msra.mxu0 %v2910_v4  ;;  %v1463_v26 = vsel %vm364_vm4, %v3388_v18, %v3392_v20  ;;  %v1567_v20 = vld [vmem:[#allocation8 + $0xc] sm:$0xf] }
 0x5cf   : > { %v1462_v31 = vsel %vm364_vm4, %v3397_v15, %v3388_v18  ;;  %v3406_v34 = vpop.permute.xlu1 %3405  ;;  %v2912_v36 = vpack.c.bf16 %v1463_v26, %v1461_v17 }
 0x5d0   : > { %v2914_v43 = vpack.c.bf16 %v1462_v31, %v1460_v16  ;;  %v3408_v35 = vunpack.i.h.bf16 %v3406_v34  ;;  %v3407_v46 = vunpack.i.l.bf16 %v3406_v34  ;;  %v3401_v49 = vpop.permute.xlu0 %3400 }
 0x5d1   : > { %v3403_v51 = vunpack.i.h.bf16 %v3401_v49  ;;  %v3402_v53 = vunpack.i.l.bf16 %v3401_v49  ;;  %2913 = vmatprep.subr.bf16.mxu0 %v2912_v36 }
 0x5d2   : > { %2915 = vmatpush1.bf16.msra.mxu0 %v2914_v43  ;;  %v1465_v59 = vsel %vm364_vm4, %v3398_v40, %v3407_v46 }
 0x5d3   : > { %v1441_v60 = vpop.permute.xlu1 %1440  ;;  %v1464_v55 = vsel %vm364_vm4, %v3403_v51, %v3398_v40  ;;  %v1467_v61 = vsel %vm364_vm4, %v3408_v35, %v3402_v53 }
 0x5d4   : > { %v1466_v62 = vsel %vm364_vm4, %v1441_v60, %v3408_v35  ;;  %v1449_v32 = vpop.permute.xlu0 %1448  ;;  %v2916_v8 = vpack.c.bf16 %v1467_v61, %v1465_v59 }
 0x5d5   : > { %v2918_v54 = vpack.c.bf16 %v1466_v62, %v1464_v55 }
 0x5d6   : > { %2917 = vmatprep.subr.bf16.mxu0 %v2916_v8 }
 0x5d7   : > { %v1451_v56 = vpop.permute.xlu1 %1450  ;;  %2919 = vmatpush1.bf16.msra.mxu0 %v2918_v54 }
 0x5d8   : > { %v1447_v0 = vpop.permute.xlu0 %1446  ;;  %v1469_v3 = vsel %vm364_vm4, %v1449_v32, %v1451_v56 }
 0x5d9   : > { %v1468_v4 = vsel %vm364_vm4, %v1447_v0, %v1449_v32  ;;  %1507 = vmatprep.subr.mxu0 %v1469_v3 }
 0x5db   : > { %1508 = vmatpush1.msra.mxu0 %v1468_v4 }
 0x5dc   : > { %2806 = vmatmul.mubr.msk.f32.vlgmr.msra.gmra.mrb[4].mxu0 %vm552_vm12, %v1397_v5 }
 0x5dd   : > { %2032 = vmatprep.mubr.f32.mxu0 %v3787_v1 }
 0x6af   : > { %v1557_v6 = vpop.f32.mrb[4].mxu0 }
 0x6b0   : > { %v1559_v7 = vpop.f32.mrb[5].mxu0  ;;  %v1564_v19 = vmax.f32 %v1557_v6, 0.0 }
 0x6b1   : > { %v1565_v18 = vmax.f32 %v1559_v7, 0.0 }
 0x6b3   : > { %1571 = vmatprep.subr.mxu1 %v1565_v18 }
 0x6b4   : > { %1572 = vmatpush1.msra.mxu1 %v1564_v19 }
 0x6b5   : > { %2921 = vmatprep.subr.bf16.mxu1 %v4176_v27  ;;  %2807 = vmatmul.mubr.msk.f32.vlgmr.msra.gmra.mrb[0].mxu1 %vm631_vm13, %v1567_v20 }
 0x6b6   : > { %2923 = vmatpush1.bf16.msra.mxu1 %v4178_v30  ;;  %1713 = vmatprep.mubr.f32.mxu1 %v3787_v1 }
 0x6b7   : > { %2925 = vmatprep.subr.bf16.mxu1 %v4184_v45 }
 0x6ba   : > { %2927 = vmatpush1.bf16.msra.mxu1 %v4189_v58 }
 0x6bb   : > { %2929 = vmatprep.subr.bf16.mxu1 %v4196_v9 }
 0x6be   : > { %2931 = vmatpush1.bf16.msra.mxu1 %v4198_v12 }
 0x6bf   : > { %2933 = vmatprep.subr.bf16.mxu1 %v4204_v22 }
 0x6c2   : > { %2935 = vmatpush1.bf16.msra.mxu1 %v4209_v39 }
 0x6c3   : > { %1665 = vmatprep.subr.mxu1 %v4212_v42 }
 0x6c6   : > { %1666 = vmatpush1.msra.mxu1 %v4217_v48 }
 0x6c7   : > { %2808 = vmatmul.mubr.msk.f32.vlgmr.msra.gmra.mrb[4].mxu1 %vm552_vm12, %v1645_v21 }
 0x6c8   : > { %1791 = vmatprep.mubr.f32.mxu1 %v3787_v1 }
 0x79a   : > { %v1715_v15 = vpop.f32.mrb[4].mxu1 }
 0x79b   : > { %v1720_v16 = vmax.f32 %v1715_v15, 0.0  ;;  %v1717_v17 = vpop.f32.mrb[5].mxu1 }
 0x79c   : > { %v1721_v26 = vmax.f32 %v1717_v17, 0.0 }
 0x79d   : > { %v1802_v31 = vmul.f32 %v1720_v16, %v4062_v28  ;;  %v1804_v34 = vmul.f32 %v1720_v16, %v4055_v25  ;;  %v1806_v36 = vmul.f32 %v1720_v16, %v4065_v29  ;;  %v1808_v40 = vmul.f32 %v1720_v16, %v4080_v38 }
 0x79e   : > { %1727 = vmatprep.subr.mxu1 %v1721_v26  ;;  %v3409_v43 = vpack.i.bf16 %v1721_v26, %v1720_v16  ;;  %v1803_v35 = vmul.f32 %v1721_v26, %v4049_v23  ;;  %v1805_v46 = vmul.f32 %v1721_v26, %v4051_v24  ;;  %v1807_v49 = vmul.f32 %v1721_v26, %v4070_v33 }
 0x79f   : > { %1728 = vmatpush1.msra.mxu1 %v1720_v16  ;;  %v1809_v51 = vmul.f32 %v1721_v26, %v4083_v41  ;;  %v1800_v60 = vmul.f32 %v1720_v16, %v4117_v2  ;;  %v1801_v62 = vmul.f32 %v1721_v26, %v4101_v52  ;;  %v1810_v8 = vmul.f32 %v1720_v16, %v4091_v47 }
 0x7a0   : > { %3410 = vrot.lane.b32.xlu1 %v3409_v43, %s3789_s23  ;;  %v3414_v53 = vpack.i.bf16 %v1803_v35, %v1802_v31  ;;  %v3424_v59 = vpack.i.bf16 %v1805_v46, %v1804_v34  ;;  %v3429_v55 = vpack.i.bf16 %v1807_v49, %v1806_v36  ;;  %v1811_v54 = vmul.f32 %v1721_v26, %v4099_v50 }
 0x7a1   : > { %v3434_v61 = vpack.i.bf16 %v1809_v51, %v1808_v40  ;;  %v3444_v32 = vpack.i.bf16 %v1801_v62, %v1800_v60 }
 0x7a2   : > { %3415 = vrot.lane.b32.xlu0 %v3414_v53, %s3795_s12 }
 0x7a4   : > { %3425 = vrot.lane.b32.xlu1 %v3424_v59, %s3794_s11 }
 0x7a6   : > { %3420 = vrot.lane.b32.xlu0 %v3409_v43, %s3793_s27 }
 0x7a8   : > { %3430 = vrot.lane.b32.xlu1 %v3429_v55, %s3797_s28 }
 0x7aa   : > { %3435 = vrot.lane.b32.xlu0 %v3434_v61, %s3798_s30 }
 0x7ac   : > { %3440 = vrot.lane.b32.xlu1 %v3409_v43, %s3796_s20 }
 0x7ae   : > { %1865 = vrot.lane.b32.xlu0 %v1810_v8, %s3799_s24 }
 0x7b0   : > { %1867 = vrot.lane.b32.xlu1 %v1811_v54, %s3799_s24 }
 0x7b2   : > { %3445 = vrot.lane.b32.xlu0 %v3444_v32, %s3792_s7 }
 0x812   : > { %v3411_v56 = vpop.permute.xlu1 %3410 }
 0x813   : > { %v3413_v0 = vunpack.i.h.bf16 %v3411_v56  ;;  %v3412_v3 = vunpack.i.l.bf16 %v3411_v56 }
 0x814   : > { %v3416_v4 = vpop.permute.xlu0 %3415 }
 0x815   : > { %v1819_v5 = vsel %vm328_vm0, %v3412_v3, %v3413_v0  ;;  %v3417_v6 = vunpack.i.l.bf16 %v3416_v4  ;;  %v3418_v18 = vunpack.i.h.bf16 %v3416_v4  ;;  %v1818_v35 = vsel %vm328_vm0, %v4108_v57, %v3412_v3 }
 0x816   : > { %v3449_v7 = vpack.i.bf16 %v3413_v0, %v1819_v5  ;;  %v3426_v19 = vpop.permute.xlu1 %3425 }
 0x817   : > { %v3428_v20 = vunpack.i.h.bf16 %v3426_v19  ;;  %v1826_v21 = vsel %vm392_vm7, %v4130_v11, %v3417_v6  ;;  %v3427_v15 = vunpack.i.l.bf16 %v3426_v19  ;;  %v1827_v31 = vsel %vm392_vm7, %v3417_v6, %v3418_v18 }
 0x818   : > { %3450 = vrot.lane.b32.xlu1 %v3449_v7, %s3792_s7  ;;  %v3421_v16 = vpop.permute.xlu0 %3420  ;;  %v3464_v53 = vpack.i.bf16 %v1827_v31, %v1818_v35  ;;  %v1723_v31 = vld [vmem:[#allocation8 + $0x10] sm:$0xf] }
 0x819   : > { %v3454_v17 = vpack.i.bf16 %v1826_v21, %v3428_v20  ;;  %v3423_v26 = vunpack.i.h.bf16 %v3421_v16  ;;  %v3422_v34 = vunpack.i.l.bf16 %v3421_v16  ;;  %v1834_v46 = vsel %vm404_vm6, %v4128_v10, %v3427_v15  ;;  %2809 = vmatmul.mubr.msk.f32.vlgmr.msra.gmra.mrb[0].mxu1 %vm631_vm13, %v1723_v31 }
 0x81a   : > { %v3431_v36 = vpop.permute.xlu1 %3430  ;;  %v1835_v60 = vsel %vm404_vm6, %v3427_v15, %v3428_v20  ;;  %2184 = vmatprep.mubr.f32.mxu1 %v3787_v1 }
 0x81b   : > { %v3433_v40 = vunpack.i.h.bf16 %v3431_v36  ;;  %v3432_v43 = vunpack.i.l.bf16 %v3431_v36  ;;  %3455 = vrot.lane.b32.xlu0 %v3454_v17, %s3792_s7  ;;  %v1840_v49 = vsel %vm284_vm5, %v3422_v34, %v3423_v26  ;;  %v3469_v8 = vpack.i.bf16 %v1835_v60, %v3418_v18 }
 0x81c   : > { %v3436_v51 = vpop.permute.xlu0 %3435  ;;  %v3459_v59 = vpack.i.bf16 %v1840_v49, %v1834_v46 }
 0x81d   : > { %v1847_v55 = vsel %vm421_vm9, %v3432_v43, %v3433_v40  ;;  %v3438_v61 = vunpack.i.h.bf16 %v3436_v51  ;;  %v3437_v62 = vunpack.i.l.bf16 %v3436_v51  ;;  %v1848_v56 = vsel %vm421_vm9, %v3433_v40, %v4132_v13 }
 0x81e   : > { %v3441_v32 = vpop.permute.xlu1 %3440  ;;  %3460 = vrot.lane.b32.xlu1 %v3459_v59, %s3792_s7  ;;  %v3474_v54 = vpack.i.bf16 %v1847_v55, %v3423_v26  ;;  %v3479_v5 = vpack.i.bf16 %v3422_v34, %v1848_v56 }
 0x81f   : > { %3465 = vrot.lane.b32.xlu0 %v3464_v53, %s3792_s7  ;;  %v1855_v0 = vsel %vm433_vm10, %v3437_v62, %v3438_v61  ;;  %v3443_v3 = vunpack.i.h.bf16 %v3441_v32  ;;  %v3442_v4 = vunpack.i.l.bf16 %v3441_v32  ;;  %v1856_v18 = vsel %vm433_vm10, %v3438_v61, %v4137_v37 }
 0x820   : > { %v3484_v6 = vpack.i.bf16 %v1855_v0, %v3432_v43  ;;  %v1866_v16 = vpop.permute.xlu0 %1865 }
 0x821   : > { %v1862_v7 = vsel %vm442_vm8, %v3443_v3, %v4145_v44  ;;  %v1861_v19 = vsel %vm442_vm8, %v3442_v4, %v3443_v3 }
 0x822   : > { %3470 = vrot.lane.b32.xlu1 %v3469_v8, %s3792_s7  ;;  %v3494_v20 = vpack.i.bf16 %v1861_v19, %v1856_v18  ;;  %v3489_v21 = vpack.i.bf16 %v3437_v62, %v1862_v7  ;;  %v1868_v15 = vpop.permute.xlu1 %1867 }
 0x823   : > { %3475 = vrot.lane.b32.xlu0 %v3474_v54, %s3792_s7  ;;  %v1869_v17 = vsel %vm454_vm11, %v1866_v16, %v1868_v15  ;;  %v1870_v26 = vsel %vm454_vm11, %v1868_v15, %v4160_v63 }
 0x824   : > { %v3446_v34 = vpop.permute.xlu0 %3445 }
 0x825   : > { %v3448_v36 = vunpack.i.h.bf16 %v3446_v34  ;;  %v3447_v40 = vunpack.i.l.bf16 %v3446_v34 }
 0x826   : > { %3480 = vrot.lane.b32.xlu1 %v3479_v5, %s3792_s7 }
 0x827   : > { %3485 = vrot.lane.b32.xlu0 %v3484_v6, %s3792_s7  ;;  %v1930_v51 = vsel %vm364_vm4, %v3447_v40, %v3448_v36  ;;  %v1929_v32 = vsel %vm364_vm4, %v4168_v14, %v3447_v40 }
 0x82a   : > { %3495 = vrot.lane.b32.xlu1 %v3494_v20, %s3792_s7 }
 0x82b   : > { %3490 = vrot.lane.b32.xlu0 %v3489_v21, %s3792_s7 }
 0x82e   : > { %1917 = vrot.lane.b32.xlu1 %v3442_v4, %s3792_s7 }
 0x82f   : > { %1925 = vrot.lane.b32.xlu0 %v1869_v17, %s3792_s7 }
 0x832   : > { %1927 = vrot.lane.b32.xlu1 %v1870_v26, %s3792_s7 }
 0x833   : > { %1923 = vrot.lane.b32.xlu0 %v1866_v16, %s3792_s7 }
 0x88a   : > { %v3451_v43 = vpop.permute.xlu1 %3450 }
 0x88b   : > { %v3453_v35 = vunpack.i.h.bf16 %v3451_v43  ;;  %v3452_v46 = vunpack.i.l.bf16 %v3451_v43 }
 0x88d   : > { %v3456_v49 = vpop.permute.xlu0 %3455  ;;  %v1932_v53 = vsel %vm364_vm4, %v3452_v46, %v3453_v35 }
 0x88e   : > { %v4494_v59 = vpack.c.bf16 %v1932_v53, %v1930_v51  ;;  %v3458_v54 = vunpack.i.h.bf16 %v3456_v49  ;;  %v3457_v4 = vunpack.i.l.bf16 %v3456_v49 }
 0x890   : > { %2937 = vmatprep.subr.bf16.mxu0 %v4494_v59  ;;  %v3461_v60 = vpop.permute.xlu1 %3460 }
 0x891   : > { %v3466_v55 = vpop.permute.xlu0 %3465  ;;  %v3462_v5 = vunpack.i.l.bf16 %v3461_v60  ;;  %v3463_v16 = vunpack.i.h.bf16 %v3461_v60 }
 0x892   : > { %v3467_v61 = vunpack.i.l.bf16 %v3466_v55  ;;  %v3468_v62 = vunpack.i.h.bf16 %v3466_v55 }
 0x894   : > { %v1931_v8 = vsel %vm364_vm4, %v3467_v61, %v3452_v46  ;;  %v3471_v0 = vpop.permute.xlu1 %3470  ;;  %v1933_v19 = vsel %vm364_vm4, %v3458_v54, %v3468_v62 }
 0x895   : > { %v4500_v56 = vpack.c.bf16 %v1931_v8, %v1929_v32  ;;  %v3476_v3 = vpop.permute.xlu0 %3475  ;;  %v3473_v6 = vunpack.i.h.bf16 %v3471_v0  ;;  %v3472_v7 = vunpack.i.l.bf16 %v3471_v0 }
 0x896   : > { %v3477_v20 = vunpack.i.l.bf16 %v3476_v3  ;;  %v3478_v36 = vunpack.i.h.bf16 %v3476_v3 }
 0x897   : > { %2939 = vmatpush1.bf16.msra.mxu0 %v4500_v56  ;;  %v1935_v18 = vsel %vm364_vm4, %v3462_v5, %v3473_v6  ;;  %v1934_v21 = vsel %vm364_vm4, %v3468_v62, %v3472_v7  ;;  %v1936_v15 = vsel %vm364_vm4, %v3473_v6, %v3457_v4 }
 0x898   : > { %v4507_v17 = vpack.c.bf16 %v1935_v18, %v1933_v19  ;;  %v3481_v26 = vpop.permute.xlu1 %3480  ;;  %v4509_v34 = vpack.c.bf16 %v1936_v15, %v1934_v21  ;;  %v1938_v51 = vsel %vm364_vm4, %v3463_v16, %v3477_v20 }
 0x899   : > { %v3486_v31 = vpop.permute.xlu0 %3485  ;;  %v3483_v40 = vunpack.i.h.bf16 %v3481_v26  ;;  %v3482_v43 = vunpack.i.l.bf16 %v3481_v26 }
 0x89a   : > { %v3487_v35 = vunpack.i.l.bf16 %v3486_v31  ;;  %2941 = vmatprep.subr.bf16.mxu0 %v4509_v34  ;;  %v3488_v60 = vunpack.i.h.bf16 %v3486_v31 }
 0x89b   : > { %v1937_v46 = vsel %vm364_vm4, %v3483_v40, %v3463_v16  ;;  %2943 = vmatpush1.bf16.msra.mxu0 %v4507_v17  ;;  %v1940_v53 = vsel %vm364_vm4, %v3478_v36, %v3482_v43  ;;  %v1872_v40 = vld [vmem:[#allocation7 + $0x38] sm:$0xff] }
 0x89c   : > { %v1939_v49 = vsel %vm364_vm4, %v3487_v35, %v3478_v36  ;;  %v3496_v61 = vpop.permute.xlu1 %3495  ;;  %v4519_v32 = vpack.c.bf16 %v1940_v53, %v1938_v51  ;;  %v1874_v36 = vld [vmem:[#allocation7 + $0x40] sm:$0xff] }
 0x89d   : > { %v4517_v55 = vpack.c.bf16 %v1939_v49, %v1937_v46  ;;  %v3491_v62 = vpop.permute.xlu0 %3490  ;;  %v3498_v8 = vunpack.i.h.bf16 %v3496_v61  ;;  %v3497_v54 = vunpack.i.l.bf16 %v3496_v61 }
 0x89e   : > { %v3493_v0 = vunpack.i.h.bf16 %v3491_v62  ;;  %v3492_v3 = vunpack.i.l.bf16 %v3491_v62  ;;  %2945 = vmatprep.subr.bf16.mxu0 %v4519_v32 }
 0x89f   : > { %2947 = vmatpush1.bf16.msra.mxu0 %v4517_v55  ;;  %v1942_v5 = vsel %vm364_vm4, %v3488_v60, %v3497_v54 }
 0x8a0   : > { %v1941_v4 = vsel %vm364_vm4, %v3493_v0, %v3488_v60  ;;  %v1944_v6 = vsel %vm364_vm4, %v3498_v8, %v3492_v3  ;;  %v1918_v7 = vpop.permute.xlu1 %1917 }
 0x8a1   : > { %v1926_v19 = vpop.permute.xlu0 %1925  ;;  %v2948_v18 = vpack.c.bf16 %v1944_v6, %v1942_v5  ;;  %v1943_v20 = vsel %vm364_vm4, %v1918_v7, %v3498_v8  ;;  %v2116_v8 = vld [vmem:[#allocation8 + $0x14] sm:$0xf] }
 0x8a2   : > { %v4527_v21 = vpack.c.bf16 %v1943_v20, %v1941_v4 }
 0x8a3   : > { %2949 = vmatprep.subr.bf16.mxu0 %v2948_v18 }
 0x8a4   : > { %v1928_v15 = vpop.permute.xlu1 %1927  ;;  %2951 = vmatpush1.bf16.msra.mxu0 %v4527_v21 }
 0x8a5   : > { %v1924_v16 = vpop.permute.xlu0 %1923  ;;  %v1946_v31 = vsel %vm364_vm4, %v1926_v19, %v1928_v15 }
 0x8a6   : > { %v4531_v26 = vsel %vm364_vm4, %v1924_v16, %v1926_v19  ;;  %1984 = vmatprep.subr.mxu0 %v1946_v31 }
 0x8a8   : > { %1985 = vmatpush1.msra.mxu0 %v4531_v26 }
 0x8a9   : > { %2953 = vmatprep.subr.bf16.mxu0 %v4176_v27  ;;  %2810 = vmatmul.mubr.msk.f32.vlgmr.msra.gmra.mrb[6].mxu0 %vm552_vm12, %v1874_v36 }
 0x8aa   : > { %2955 = vmatpush1.bf16.msra.mxu0 %v4178_v30  ;;  %2106 = vmatprep.mubr.f32.mxu0 %v3787_v1 }
 0x8ab   : > { %2957 = vmatprep.subr.bf16.mxu0 %v4184_v45 }
 0x8ae   : > { %2959 = vmatpush1.bf16.msra.mxu0 %v4189_v58 }
 0x8af   : > { %2961 = vmatprep.subr.bf16.mxu0 %v4196_v9 }
 0x8b2   : > { %2963 = vmatpush1.bf16.msra.mxu0 %v4198_v12 }
 0x8b3   : > { %2965 = vmatprep.subr.bf16.mxu0 %v4204_v22 }
 0x8b6   : > { %2967 = vmatpush1.bf16.msra.mxu0 %v4209_v39 }
 0x8b7   : > { %2058 = vmatprep.subr.mxu0 %v4212_v42 }
 0x8ba   : > { %2059 = vmatpush1.msra.mxu0 %v4217_v48 }
 0x8bb   : > { %2811 = vmatmul.mubr.msk.f32.vlgmr.msra.gmra.mrb[6].mxu0 %vm552_vm12, %v1872_v40 }
 0x98e   : > { %v2108_v43 = vpop.f32.mrb[6].mxu0 }
 0x98f   : > { %v2113_v35 = vmax.f32 %v2108_v43, 0.0  ;;  %v2110_v46 = vpop.f32.mrb[7].mxu0 }
 0x990   : > { %v2114_v49 = vmax.f32 %v2110_v46, 0.0 }
 0x991   : > { %v2195_v51 = vmul.f32 %v2113_v35, %v4062_v28  ;;  %v2197_v53 = vmul.f32 %v2113_v35, %v4055_v25  ;;  %v2199_v60 = vmul.f32 %v2113_v35, %v4065_v29  ;;  %v2201_v61 = vmul.f32 %v2113_v35, %v4080_v38 }
 0x992   : > { %2120 = vmatprep.subr.mxu1 %v2114_v49  ;;  %v3499_v62 = vpack.i.bf16 %v2114_v49, %v2113_v35  ;;  %v2196_v54 = vmul.f32 %v2114_v49, %v4049_v23  ;;  %v2198_v0 = vmul.f32 %v2114_v49, %v4051_v24  ;;  %v2200_v3 = vmul.f32 %v2114_v49, %v4070_v33 }
 0x993   : > { %2121 = vmatpush1.msra.mxu1 %v2113_v35  ;;  %v2202_v4 = vmul.f32 %v2114_v49, %v4083_v41  ;;  %v2193_v5 = vmul.f32 %v2113_v35, %v4117_v2  ;;  %v2194_v23 = vmul.f32 %v2114_v49, %v4101_v52  ;;  %v2203_v33 = vmul.f32 %v2113_v35, %v4091_v47  ;;  %v2267_v52 = vld [vmem:[#allocation7 + $0x50] sm:$0xff] }
 0x994   : > { %3500 = vrot.lane.b32.xlu1 %v3499_v62, %s3789_s23  ;;  %2969 = vmatprep.subr.bf16.mxu1 %v4494_v59  ;;  %v3504_v25 = vpack.i.bf16 %v2196_v54, %v2195_v51  ;;  %v3514_v28 = vpack.i.bf16 %v2198_v0, %v2197_v53  ;;  %v3519_v29 = vpack.i.bf16 %v2200_v3, %v2199_v60 }
 0x995   : > { %2812 = vmatmul.mubr.msk.f32.vlgmr.msra.gmra.mrb[0].mxu1 %vm631_vm13, %v2116_v8  ;;  %v3524_v38 = vpack.i.bf16 %v2202_v4, %v2201_v61  ;;  %v3534_v24 = vpack.i.bf16 %v2194_v23, %v2193_v5  ;;  %v2204_v41 = vmul.f32 %v2114_v49, %v4099_v50 }
 0x996   : > { %2971 = vmatpush1.bf16.msra.mxu1 %v4500_v56  ;;  %3505 = vrot.lane.b32.xlu0 %v3504_v25, %s3795_s12 }
 0x997   : > { %2973 = vmatprep.subr.bf16.mxu1 %v4509_v34  ;;  %2335 = vmatprep.mubr.f32.mxu1 %v3787_v1 }
 0x998   : > { %3515 = vrot.lane.b32.xlu1 %v3514_v28, %s3794_s11 }
 0x99a   : > { %2975 = vmatpush1.bf16.msra.mxu1 %v4507_v17  ;;  %3510 = vrot.lane.b32.xlu0 %v3499_v62, %s3793_s27  ;;  %v2265_v17 = vld [vmem:[#allocation7 + $0x48] sm:$0xff]  ;;  %s3707_s27 = sshll.u32 %s3800_s19, 4  ;;  %s3708_s27 = int_to_ptr.vmem [resolvable:$false] %s3707_s27 }
 0x99b   : > { %2977 = vmatprep.subr.bf16.mxu1 %v4519_v32  ;;  %s3709_s11 = scalar_lea.vmem %s3708_s27, 256  ;;  %p3710_p3 = scmp.lt.s32.totalorder %s4659_s25, %s3708_s27 }
 0x99c   : > { %3520 = vrot.lane.b32.xlu1 %v3519_v29, %s3797_s28 }
 0x99e   : > { %2979 = vmatpush1.bf16.msra.mxu1 %v4517_v55  ;;  %3525 = vrot.lane.b32.xlu0 %v3524_v38, %s3798_s30 }
 0x99f   : > { %2981 = vmatprep.subr.bf16.mxu1 %v2948_v18 }
 0x9a0   : > { %3530 = vrot.lane.b32.xlu1 %v3499_v62, %s3796_s20 }
 0x9a2   : > { %2983 = vmatpush1.bf16.msra.mxu1 %v4527_v21  ;;  %2258 = vrot.lane.b32.xlu0 %v2203_v33, %s3799_s24 }
 0x9a3   : > { %2287 = vmatprep.subr.mxu1 %v1946_v31 }
 0x9a4   : > { %2260 = vrot.lane.b32.xlu1 %v2204_v41, %s3799_s24 }
 0x9a6   : > { %2288 = vmatpush1.msra.mxu1 %v4531_v26  ;;  %3535 = vrot.lane.b32.xlu0 %v3534_v24, %s3792_s7 }
 0x9a7   : > { %2985 = vmatprep.subr.bf16.mxu1 %v4176_v27  ;;  %2813 = vmatmul.mubr.msk.f32.vlgmr.msra.gmra.mrb[6].mxu1 %vm552_vm12, %v2267_v52 }
 0x9a8   : > { %2987 = vmatpush1.bf16.msra.mxu1 %v4178_v30  ;;  %2409 = vmatprep.mubr.f32.mxu1 %v3787_v1 }
 0x9a9   : > { %2989 = vmatprep.subr.bf16.mxu1 %v4184_v45 }
 0x9ac   : > { %2991 = vmatpush1.bf16.msra.mxu1 %v4189_v58 }
 0x9ad   : > { %2993 = vmatprep.subr.bf16.mxu1 %v4196_v9 }
 0x9b0   : > { %2995 = vmatpush1.bf16.msra.mxu1 %v4198_v12 }
 0x9b1   : > { %2997 = vmatprep.subr.bf16.mxu1 %v4204_v22 }
 0x9b4   : > { %2999 = vmatpush1.bf16.msra.mxu1 %v4209_v39 }
 0x9b5   : > { %2361 = vmatprep.subr.mxu1 %v4212_v42 }
 0x9b8   : > { %2362 = vmatpush1.msra.mxu1 %v4217_v48 }
 0x9b9   : > { %2814 = vmatmul.mubr.msk.f32.vlgmr.msra.gmra.mrb[6].mxu1 %vm552_vm12, %v2265_v17 }
 0x9ba   : > { %2575 = vmatprep.mubr.f32.mxu1 %v3787_v1 }
 0xa06   : > { %v3501_v47 = vpop.permute.xlu1 %3500 }
 0xa07   : > { %v3503_v50 = vunpack.i.h.bf16 %v3501_v47  ;;  %v3502_v2 = vunpack.i.l.bf16 %v3501_v47 }
 0xa08   : > { %v3506_v27 = vpop.permute.xlu0 %3505 }
 0xa09   : > { %v2212_v30 = vsel %vm328_vm0, %v3502_v2, %v3503_v50  ;;  %v3507_v45 = vunpack.i.l.bf16 %v3506_v27  ;;  %v3508_v59 = vunpack.i.h.bf16 %v3506_v27 }
 0xa0a   : > { %v3539_v58 = vpack.i.bf16 %v3503_v50, %v2212_v30  ;;  %v3516_v9 = vpop.permute.xlu1 %3515 }
 0xa0b   : > { %v3518_v56 = vunpack.i.h.bf16 %v3516_v9  ;;  %v2219_v12 = vsel %vm392_vm7, %v4130_v11, %v3507_v45  ;;  %v3517_v22 = vunpack.i.l.bf16 %v3516_v9  ;;  %v2220_v34 = vsel %vm392_vm7, %v3507_v45, %v3508_v59 }
 0xa0c   : > { %3540 = vrot.lane.b32.xlu1 %v3539_v58, %s3792_s7  ;;  %v3511_v39 = vpop.permute.xlu0 %3510  ;;  %v2211_v11 = vsel %vm328_vm0, %v4108_v57, %v3502_v2 }
 0xa0d   : > { %v3544_v42 = vpack.i.bf16 %v2219_v12, %v3518_v56  ;;  %v3513_v48 = vunpack.i.h.bf16 %v3511_v39  ;;  %v3512_v55 = vunpack.i.l.bf16 %v3511_v39  ;;  %v2227_v19 = vsel %vm404_vm6, %v4128_v10, %v3517_v22 }
 0xa0e   : > { %v3521_v32 = vpop.permute.xlu1 %3520  ;;  %v3554_v21 = vpack.i.bf16 %v2220_v34, %v2211_v11  ;;  %v2228_v16 = vsel %vm404_vm6, %v3517_v22, %v3518_v56 }
 0xa0f   : > { %v3523_v6 = vunpack.i.h.bf16 %v3521_v32  ;;  %v3522_v7 = vunpack.i.l.bf16 %v3521_v32  ;;  %3545 = vrot.lane.b32.xlu0 %v3544_v42, %s3792_s7  ;;  %v2233_v18 = vsel %vm284_vm5, %v3512_v55, %v3513_v48  ;;  %v3559_v57 = vpack.i.bf16 %v2228_v16, %v3508_v59 }
 0xa10   : > { %v3526_v20 = vpop.permute.xlu0 %3525  ;;  %v3549_v15 = vpack.i.bf16 %v2233_v18, %v2227_v19 }
 0xa11   : > { %v2240_v26 = vsel %vm421_vm9, %v3522_v7, %v3523_v6  ;;  %v3528_v31 = vunpack.i.h.bf16 %v3526_v20  ;;  %v3527_v36 = vunpack.i.l.bf16 %v3526_v20  ;;  %v2241_v10 = vsel %vm421_vm9, %v3523_v6, %v4132_v13 }
 0xa12   : > { %v3531_v40 = vpop.permute.xlu1 %3530  ;;  %3550 = vrot.lane.b32.xlu1 %v3549_v15, %s3792_s7  ;;  %v3564_v43 = vpack.i.bf16 %v2240_v26, %v3513_v48  ;;  %v3569_v51 = vpack.i.bf16 %v3512_v55, %v2241_v10 }
 0xa13   : > { %3555 = vrot.lane.b32.xlu0 %v3554_v21, %s3792_s7  ;;  %v2248_v35 = vsel %vm433_vm10, %v3527_v36, %v3528_v31  ;;  %v3533_v46 = vunpack.i.h.bf16 %v3531_v40  ;;  %v3532_v49 = vunpack.i.l.bf16 %v3531_v40  ;;  %v2249_v13 = vsel %vm433_vm10, %v3528_v31, %v4137_v37 }
 0xa14   : > { %v3574_v53 = vpack.i.bf16 %v2248_v35, %v3522_v7  ;;  %v2259_v0 = vpop.permute.xlu0 %2258 }
 0xa15   : > { %v2255_v60 = vsel %vm442_vm8, %v3533_v46, %v4145_v44  ;;  %v2254_v61 = vsel %vm442_vm8, %v3532_v49, %v3533_v46 }
 0xa16   : > { %3560 = vrot.lane.b32.xlu1 %v3559_v57, %s3792_s7  ;;  %v3584_v62 = vpack.i.bf16 %v2254_v61, %v2249_v13  ;;  %v3579_v8 = vpack.i.bf16 %v3527_v36, %v2255_v60  ;;  %v2261_v54 = vpop.permute.xlu1 %2260 }
 0xa17   : > { %3565 = vrot.lane.b32.xlu0 %v3564_v43, %s3792_s7  ;;  %v2262_v3 = vsel %vm454_vm11, %v2259_v0, %v2261_v54  ;;  %v2263_v44 = vsel %vm454_vm11, %v2261_v54, %v4160_v63 }
 0xa18   : > { %v3536_v37 = vpop.permute.xlu0 %3535 }
 0xa19   : > { %v3538_v4 = vunpack.i.h.bf16 %v3536_v37  ;;  %v3537_v25 = vunpack.i.l.bf16 %v3536_v37  ;;  %v2417_v37 = vld [vmem:[#allocation7 + $0x58] sm:$0xff] }
 0xa1a   : > { %3570 = vrot.lane.b32.xlu1 %v3569_v51, %s3792_s7 }
 0xa1b   : > { %3575 = vrot.lane.b32.xlu0 %v3574_v53, %s3792_s7  ;;  %v2473_v23 = vsel %vm364_vm4, %v3537_v25, %v3538_v4  ;;  %v2472_v50 = vsel %vm364_vm4, %v4168_v14, %v3537_v25 }
 0xa1e   : > { %3585 = vrot.lane.b32.xlu1 %v3584_v62, %s3792_s7 }
 0xa1f   : > { %3580 = vrot.lane.b32.xlu0 %v3579_v8, %s3792_s7 }
 0xa22   : > { %2460 = vrot.lane.b32.xlu1 %v3532_v49, %s3792_s7 }
 0xa23   : > { %2468 = vrot.lane.b32.xlu0 %v2262_v3, %s3792_s7 }
 0xa26   : > { %2470 = vrot.lane.b32.xlu1 %v2263_v44, %s3792_s7 }
 0xa27   : > { %2466 = vrot.lane.b32.xlu0 %v2259_v0, %s3792_s7  ;;  %s3703_s7 = scalar_lea.vmem %s4659_s25, 128 }
 0xa28   : > { %p3704_p1 = scmp.ne.s32.totalorder %s4659_s25, %s3703_s7  ;;  %p3711_p7 = scmp.lt.s32.totalorder %s3709_s11, %s3703_s7 }
 0xa2a   : > { %p3705_p4 = pnand %p3704_p1, %p3964_p6  ;;  %p3712_p10 = por %p3711_p7, %p3710_p3 }
 0xa2c   : > { %p3706_p8 = pneg %p3705_p4 }
 0xa2e   : > { %p3713_p13 = pnand %p3712_p10, %p3706_p8 }
 0xa7e   : > { %v3541_v28 = vpop.permute.xlu1 %3540 }
 0xa7f   : > { %v3543_v29 = vunpack.i.h.bf16 %v3541_v28  ;;  %v3542_v38 = vunpack.i.l.bf16 %v3541_v28 }
 0xa81   : > { %v3546_v5 = vpop.permute.xlu0 %3545  ;;  %v2475_v24 = vsel %vm364_vm4, %v3542_v38, %v3543_v29 }
 0xa82   : > { %v3000_v33 = vpack.c.bf16 %v2475_v24, %v2473_v23  ;;  %v3548_v27 = vunpack.i.h.bf16 %v3546_v5  ;;  %v3547_v59 = vunpack.i.l.bf16 %v3546_v5 }
 0xa84   : > { %3001 = vmatprep.subr.bf16.mxu1 %v3000_v33  ;;  %v3551_v41 = vpop.permute.xlu1 %3550 }
 0xa85   : > { %v3556_v52 = vpop.permute.xlu0 %3555  ;;  %v3552_v9 = vunpack.i.l.bf16 %v3551_v41  ;;  %v3553_v17 = vunpack.i.h.bf16 %v3551_v41 }
 0xa86   : > { %v3557_v63 = vunpack.i.l.bf16 %v3556_v52  ;;  %v3558_v47 = vunpack.i.h.bf16 %v3556_v52 }
 0xa88   : > { %v2474_v2 = vsel %vm364_vm4, %v3557_v63, %v3542_v38  ;;  %v3561_v45 = vpop.permute.xlu1 %3560  ;;  %v2476_v22 = vsel %vm364_vm4, %v3548_v27, %v3558_v47  ;;  %v2587_v38 = vld [vmem:[#allocation8 + $0x18] sm:$0xf] }
 0xa89   : > { %v3002_v30 = vpack.c.bf16 %v2474_v2, %v2472_v50  ;;  %v3566_v58 = vpop.permute.xlu0 %3565  ;;  %v3563_v56 = vunpack.i.h.bf16 %v3561_v45  ;;  %v3562_v12 = vunpack.i.l.bf16 %v3561_v45 }
 0xa8a   : > { %v3567_v42 = vunpack.i.l.bf16 %v3566_v58  ;;  %v3568_v7 = vunpack.i.h.bf16 %v3566_v58 }
 0xa8b   : > { %3003 = vmatpush1.bf16.msra.mxu1 %v3002_v30  ;;  %v2478_v39 = vsel %vm364_vm4, %v3552_v9, %v3563_v56  ;;  %v2477_v48 = vsel %vm364_vm4, %v3558_v47, %v3562_v12  ;;  %v2479_v14 = vsel %vm364_vm4, %v3563_v56, %v3547_v59 }
 0xa8c   : > { %v3006_v34 = vpack.c.bf16 %v2478_v39, %v2476_v22  ;;  %v3571_v55 = vpop.permute.xlu1 %3570  ;;  %v3004_v6 = vpack.c.bf16 %v2479_v14, %v2477_v48  ;;  %v2481_v15 = vsel %vm364_vm4, %v3553_v17, %v3567_v42 }
 0xa8d   : > { %v3576_v32 = vpop.permute.xlu0 %3575  ;;  %v3573_v11 = vunpack.i.h.bf16 %v3571_v55  ;;  %v3572_v19 = vunpack.i.l.bf16 %v3571_v55 }
 0xa8e   : > { %v3577_v18 = vunpack.i.l.bf16 %v3576_v32  ;;  %3005 = vmatprep.subr.bf16.mxu1 %v3004_v6  ;;  %v3578_v26 = vunpack.i.h.bf16 %v3576_v32 }
 0xa8f   : > { %v2480_v20 = vsel %vm364_vm4, %v3573_v11, %v3553_v17  ;;  %3007 = vmatpush1.bf16.msra.mxu1 %v3006_v34  ;;  %v2483_v16 = vsel %vm364_vm4, %v3568_v7, %v3572_v19 }
 0xa90   : > { %v2482_v21 = vsel %vm364_vm4, %v3577_v18, %v3568_v7  ;;  %v3586_v36 = vpop.permute.xlu1 %3585  ;;  %v3008_v57 = vpack.c.bf16 %v2483_v16, %v2481_v15 }
 0xa91   : > { %v3010_v31 = vpack.c.bf16 %v2482_v21, %v2480_v20  ;;  %v3581_v40 = vpop.permute.xlu0 %3580  ;;  %v3588_v43 = vunpack.i.h.bf16 %v3586_v36  ;;  %v3587_v10 = vunpack.i.l.bf16 %v3586_v36 }
 0xa92   : > { %v3583_v35 = vunpack.i.h.bf16 %v3581_v40  ;;  %v3582_v46 = vunpack.i.l.bf16 %v3581_v40  ;;  %3009 = vmatprep.subr.bf16.mxu1 %v3008_v57 }
 0xa93   : > { %3011 = vmatpush1.bf16.msra.mxu1 %v3010_v31  ;;  %v2485_v51 = vsel %vm364_vm4, %v3578_v26, %v3587_v10 }
 0xa94   : > { %v2484_v49 = vsel %vm364_vm4, %v3583_v35, %v3578_v26  ;;  %v2487_v53 = vsel %vm364_vm4, %v3588_v43, %v3582_v46  ;;  %v2461_v60 = vpop.permute.xlu1 %2460 }
 0xa95   : > { %v2469_v61 = vpop.permute.xlu0 %2468  ;;  %v3012_v13 = vpack.c.bf16 %v2487_v53, %v2485_v51  ;;  %v2486_v62 = vsel %vm364_vm4, %v2461_v60, %v3588_v43 }
 0xa96   : > { %v3014_v8 = vpack.c.bf16 %v2486_v62, %v2484_v49 }
 0xa97   : > { %3013 = vmatprep.subr.bf16.mxu1 %v3012_v13 }
 0xa98   : > { %v2471_v54 = vpop.permute.xlu1 %2470  ;;  %3015 = vmatpush1.bf16.msra.mxu1 %v3014_v8 }
 0xa99   : > { %v2467_v0 = vpop.permute.xlu0 %2466  ;;  %v2489_v44 = vsel %vm364_vm4, %v2469_v61, %v2471_v54 }
 0xa9a   : > { %v2488_v3 = vsel %vm364_vm4, %v2467_v0, %v2469_v61  ;;  %2527 = vmatprep.subr.mxu1 %v2489_v44 }
 0xa9c   : > { %2528 = vmatpush1.msra.mxu1 %v2488_v3 }
 0xa9d   : > { %2815 = vmatmul.mubr.msk.f32.vlgmr.msra.gmra.mrb[6].mxu1 %vm552_vm12, %v2417_v37 }
 0xa9e   : > { %2655 = vmatprep.mubr.f32.mxu1 %v3787_v1 }
 0xb70   : > { %v2577_v4 = vpop.f32.mrb[6].mxu1 }
 0xb71   : > { %v2579_v25 = vpop.f32.mrb[7].mxu1  ;;  %v2584_v29 = vmax.f32 %v2577_v4, 0.0 }
 0xb72   : > { %v2585_v28 = vmax.f32 %v2579_v25, 0.0 }
 0xb74   : > { %2591 = vmatprep.subr.mxu1 %v2585_v28 }
 0xb75   : > { %2592 = vmatpush1.msra.mxu1 %v2584_v29 }
 0xb76   : > { %2816 = vmatmul.mubr.msk.f32.vlgmr.msra.gmra.mrb[0].mxu1 %vm631_vm13, %v2587_v38 }
 0xc49   : > { %v2657_v5 = vpop.f32.mrb[0].mxu1 }
 0xc4a   : > { %v2659_v23 = vpop.f32.mrb[1].mxu1 }
 0xc4b   : > { %v2666_v24 = vcombine.low %v2657_v5, %v2659_v23 }
 0xc4d   : > { %2668 = vst [vmem:[%s255_s8] sm:$0xff] %v2666_v24 }
 0xc4e   : > { %3716 = shalt.err (!%p3713_p13)
}
 0xc4f   : > { %s3717_s5 = scalar_lea.hbm %s4657_s29, 128  ;;  %s3721_s28 = scalar_lea.hbm %s4705_s4, 256 }
 0xc50   : > { %p3718_p5 = scmp.ne.s32.totalorder %s4657_s29, %s3717_s5  ;;  %p3722_p9 = scmp.lt.u32.totalorder %s4657_s29, %s4705_s4 }
 0xc51   : > { %p3723_p12 = scmp.lt.u32.totalorder %s3721_s28, %s3717_s5  ;;  %p3725_p1 = scmp.lt.u32.totalorder %s3717_s5, %s4657_s29 }
 0xc52   : > { %p3719_p0 = pnand %p3718_p5, %p3964_p6 }
 0xc53   : > { %p3724_p2 = por %p3723_p12, %p3722_p9 }
 0xc54   : > { %p3720_p11 = pneg %p3719_p0 }
 0xc55   : > { %p3726_p4 = por %p3725_p1, %p3724_p2 }
 0xc57   : > { %p3727_p8 = pnand %p3726_p4, %p3720_p11 }
 0xc59   : > { %3730 = shalt.err (!%p3727_p8)
}
 0xc5a   : > { %3054 = dma.vmem_to_hbm [thread:$0]  (%p3964_p6), %s4659_s25, 128, %s4657_s29, %s2670_s6  }
 0xc5b PF: > { %s2696_s26 = sand.u32 1, %s3765_s15   ;;  %p4723_p3 = scmp.ne.s32.totalorder %s4710_s22, 0 }
 0xc5c   : > { %p4724_p7 = scmp.ge.s32.totalorder %s3777_s18, 2  ;;  %s2697_s10 = scalar_lea.sflag [#allocation4], %s2696_s26 }
 0xc5e   : > { %p3071_p10 = pnand %p4724_p7, %p4723_p3 }
 0xc60   : > { %3760 = dma.done.wait (!%p3071_p10), %s2697_s10, 128  }
 0xc61   : > { %3762 = vsyncadd (!%p3071_p10), %s2697_s10, 4294967168  ;;  %p19_p13 = scmp.ge.s32.totalorder %s3950_s9, 4   ;;  %s4725_s15 = smov %s3769_s16 }
 0xc62   : > { %s4726_s16 = smov %s3773_s17  ;;  %s4727_s17 = smov %s3960_s13 }
 0xc63   : > { %s4728_s18 = smov %s3950_s9  ;;  %21 = sbr.rel (!%p19_p13) target bundleno = 7 (0x7), region = 110 }
 0xc6a   :  { %2702 = vsyncpa [#allocation3], 1 }
 0xc6b   :  { %2704 = vsyncpa [#allocation3 + $0x1], 1 }
 0xc6c   :  { %2705 = vsyncpa [#allocation6], 1 }
 0xc6d   :  { %2706 = vsyncpa [#allocation9], 1 }
 0xc6e   :  { %2707 = vsyncpa [#allocation4], 1 }
 0xc6f   :  { %2709 = vsyncpa [#allocation4 + $0x1], 1 }

</bundles_post_ra>
